<compile_context>
chip_gen: v7x
topology: tpu7x:2x2x1
jax: 0.10.0
libtpu: 0.0.40
codegen_flags: <defaults>
</compile_context>

<pallas_src>
import functools

import jax
import jax.numpy as jnp
from jax import lax
from jax.experimental import pallas as pl
from jax.experimental.pallas import tpu as pltpu


def _round_up(x, m):
    return ((x + m - 1) // m) * m


def gru_fused_kernel(x_ref, wih_ref, whh_ref, bc_ref, bn_ref, h_out_ref,
                     gi_scr, h_scr, *, t_chunk, n_tchunks, t_total, b_tile, hp):
    """One grid step = (one batch tile) x (one time chunk).

    Grid = (n_btiles ["parallel"], n_tchunks ["arbitrary"]).  The hidden state
    persists in h_scr across the time-chunk axis: zeroed at tc == 0, written to
    the output at tc == n_tchunks - 1.
    """
    tc = pl.program_id(1)

    @pl.when(tc == 0)
    def _():
        h_scr[...] = jnp.zeros_like(h_scr)

    # ---- fused input projection for this chunk: one MXU matmul --------------
    # (t_chunk*b_tile, D) @ (D, 3*Hp) + b.  The leading-dim merge reshape is a
    # layout no-op because b_tile is a multiple of the f32 sublane tile (8).
    d_in = x_ref.shape[-1]
    x2d = x_ref[...].reshape(t_chunk * b_tile, d_in)
    gi_scr[...] = (
        jnp.dot(x2d, wih_ref[...], preferred_element_type=jnp.float32)
        + bc_ref[...]
    )

    # Hoist the n-gate hidden-bias broadcast out of the serial time loop
    # (JAX does not CSE broadcast_in_dim).
    bn = jnp.broadcast_to(bn_ref[...], (b_tile, hp))

    def step(t, carry):
        h_prev = h_scr[...]                                    # (b_tile, Hp) f32
        row = pl.multiple_of(t * b_tile, b_tile)
        gi_t = gi_scr[pl.ds(row, b_tile), :]                   # (b_tile, 3*Hp)
        gh = jnp.dot(h_prev, whh_ref[...],
                     preferred_element_type=jnp.float32)       # (b_tile, 3*Hp)
        # PyTorch GRU gate order r, z, n; all slices are 128-lane aligned.
        r = jax.nn.sigmoid(gi_t[:, 0:hp] + gh[:, 0:hp])
        z = jax.nn.sigmoid(gi_t[:, hp:2 * hp] + gh[:, hp:2 * hp])
        n = jnp.tanh(gi_t[:, 2 * hp:3 * hp] + r * (gh[:, 2 * hp:3 * hp] + bn))
        h_scr[...] = (1.0 - z) * n + z * h_prev
        return carry

    def run(nsteps):
        # Small fixed unroll: lets the scheduler overlap step t's matmul with
        # step t-1's EUP/VPU gate epilogue without code-size blowup.
        lax.fori_loop(0, nsteps, step, 0,
                      unroll=(nsteps if nsteps <= 8 else 4))

    rem = t_total - (n_tchunks - 1) * t_chunk   # static remainder, 1..t_chunk
    if rem == t_chunk:
        run(t_chunk)
    else:
        @pl.when(tc < n_tchunks - 1)
        def _():
            run(t_chunk)

        @pl.when(tc == n_tchunks - 1)
        def _():
            run(rem)

    @pl.when(tc == n_tchunks - 1)
    def _():
        h_out_ref[...] = h_scr[...].astype(h_out_ref.dtype)


def rnn_encoder_forward(x, params, *, b_tile_max=128, gi_budget_bytes=2 << 20):
    """x: (B, T, D) batch_first, like nn.GRU(batch_first=True, num_layers=1).
    Returns h of shape (1, B, H): the final hidden state."""
    w_ih, w_hh, b_ih, b_hh = params            # (3H, D), (3H, H), (3H,), (3H,)
    B, T, D = x.shape
    H = w_hh.shape[1]
    f32 = jnp.float32

    Hp = _round_up(H, 128)                     # lane-dense gate width
    G = 3 * Hp
    B_tile = min(b_tile_max, _round_up(B, 8))  # wide MXU-friendly batch tile
    Bp = _round_up(B, B_tile)
    n_btiles = Bp // B_tile
    # TODO(synk): on v7x pick an even n_btiles (2 TensorCores) when B allows.

    # Time-chunk size from a VMEM budget for the in-kernel gi scratch.
    t_chunk = int(max(1, min(T, gi_budget_bytes // (B_tile * G * 4))))
    n_tchunks = int(pl.cdiv(T, t_chunk))
    T_pad = n_tchunks * t_chunk

    # ---- padded weight/bias layout: gate g occupies columns [g*Hp, g*Hp+H) ---
    # (On v6e/v7x: cast wih_t/whh_t to bf16 here + bf16 dot operands in-kernel;
    #  kept f32 for v5e-safety and exact parity with the f32 reference.)
    wih_t = jnp.zeros((D, G), f32)
    whh_t = jnp.zeros((Hp, G), f32)
    for g in range(3):
        wih_t = wih_t.at[:, g * Hp:g * Hp + H].set(
            w_ih[g * H:(g + 1) * H, :].T.astype(f32))
        whh_t = whh_t.at[:H, g * Hp:g * Hp + H].set(
            w_hh[g * H:(g + 1) * H, :].T.astype(f32))

    # b_comb = b_ih + b_hh for the r,z gates; b_ih only for the n gate (PyTorch
    # keeps b_hh(n) inside r * (...)); bhh_n is the n-gate hidden bias.
    b_comb = jnp.zeros((1, G), f32)
    b_comb = b_comb.at[0, 0:H].set((b_ih[0:H] + b_hh[0:H]).astype(f32))
    b_comb = b_comb.at[0, Hp:Hp + H].set(
        (b_ih[H:2 * H] + b_hh[H:2 * H]).astype(f32))
    b_comb = b_comb.at[0, 2 * Hp:2 * Hp + H].set(b_ih[2 * H:3 * H].astype(f32))
    bhh_n = jnp.zeros((1, Hp), f32)
    bhh_n = bhh_n.at[0, 0:H].set(b_hh[2 * H:3 * H].astype(f32))

    # ---- time-major x, padded only in batch (sublane tile) and time (chunking);
    # the input dim D stays un-padded (full-extent last block dim). -------------
    x_tm = jnp.zeros((T_pad, Bp, D), f32)
    x_tm = x_tm.at[:T, :B, :].set(jnp.transpose(x, (1, 0, 2)).astype(f32))

    h_pad = pl.pallas_call(
        functools.partial(gru_fused_kernel, t_chunk=t_chunk, n_tchunks=n_tchunks,
                          t_total=T, b_tile=B_tile, hp=Hp),
        out_shape=jax.ShapeDtypeStruct((Bp, Hp), f32),
        grid_spec=pltpu.PrefetchScalarGridSpec(
            num_scalar_prefetch=0,
            grid=(n_btiles, n_tchunks),
            in_specs=[
                pl.BlockSpec((t_chunk, B_tile, D), lambda b, tc: (tc, b, 0)),  # x chunk
                pl.BlockSpec((D, G), lambda b, tc: (0, 0)),                    # W_ih^T (resident)
                pl.BlockSpec((Hp, G), lambda b, tc: (0, 0)),                   # W_hh^T (resident)
                pl.BlockSpec((1, G), lambda b, tc: (0, 0)),                    # fused input biases
                pl.BlockSpec((1, Hp), lambda b, tc: (0, 0)),                   # n-gate hidden bias
            ],
            out_specs=pl.BlockSpec((B_tile, Hp), lambda b, tc: (b, 0)),
            scratch_shapes=[
                pltpu.VMEM((t_chunk * B_tile, G), jnp.float32),  # gi chunk (never hits HBM)
                pltpu.VMEM((B_tile, Hp), jnp.float32),           # hidden-state accumulator
            ]),
        compiler_params=pltpu.CompilerParams(
            dimension_semantics=("parallel", "arbitrary")),
    )(x_tm, wih_t, whh_t, b_comb, bhh_n)

    h = h_pad[:B, :H].astype(x.dtype)
    return h[None, :, :]                      # (1, B, H) like PyTorch's h


def gru_reference(x, params):
    """Pure-JAX reference of torch.nn.GRU forward (final hidden state only)."""
    w_ih, w_hh, b_ih, b_hh = params
    B, T, D = x.shape
    H = w_hh.shape[1]

    def step(h, x_t):
        gi = x_t @ w_ih.T + b_ih
        gh = h @ w_hh.T + b_hh
        i_r, i_z, i_n = gi[:, :H], gi[:, H:2 * H], gi[:, 2 * H:]
        h_r, h_z, h_n = gh[:, :H], gh[:, H:2 * H], gh[:, 2 * H:]
        r = jax.nn.sigmoid(i_r + h_r)
        z = jax.nn.sigmoid(i_z + h_z)
        n = jnp.tanh(i_n + r * h_n)
        h_new = (1.0 - z) * n + z * h
        return h_new, None

    h0 = jnp.zeros((B, H), x.dtype)
    h_final, _ = lax.scan(step, h0, jnp.transpose(x, (1, 0, 2)))
    return h_final[None, :, :]


if __name__ == "__main__":
    B, T, D_in, H = 2, 8, 4, 32

    key = jax.random.PRNGKey(0)
    k_x, k_wih, k_whh, k_bih, k_bhh = jax.random.split(key, 5)

    # Deterministic init mirroring torch's uniform(-1/sqrt(H), 1/sqrt(H)).
    bound = 1.0 / jnp.sqrt(jnp.float32(H))
    w_ih = jax.random.uniform(k_wih, (3 * H, D_in), jnp.float32, -bound, bound)
    w_hh = jax.random.uniform(k_whh, (3 * H, H), jnp.float32, -bound, bound)
    b_ih = jax.random.uniform(k_bih, (3 * H,), jnp.float32, -bound, bound)
    b_hh = jax.random.uniform(k_bhh, (3 * H,), jnp.float32, -bound, bound)
    params = (w_ih, w_hh, b_ih, b_hh)

    x = jax.random.normal(k_x, (B, T, D_in), jnp.float32)

    h = rnn_encoder_forward(x, params)
    jax.block_until_ready(h)

    h_ref = gru_reference(x, params)
    assert h.shape == (1, B, H), h.shape
    assert jnp.allclose(h, h_ref, atol=1e-5, rtol=1e-5), "mismatch vs reference GRU"

    print("KERNEL_OK")
</pallas_src>

<mosaic_0001>
module attributes {stable_mosaic.version = 11 : i64} {
  func.func @gru_fused_kernel(%arg0: i32, %arg1: i32, %arg2: memref<8x8x4xf32, #tpu.memory_space<vmem>>, %arg3: memref<4x384xf32, #tpu.memory_space<vmem>>, %arg4: memref<128x384xf32, #tpu.memory_space<vmem>>, %arg5: memref<1x384xf32, #tpu.memory_space<vmem>>, %arg6: memref<1x128xf32, #tpu.memory_space<vmem>>, %arg7: memref<8x128xf32, #tpu.memory_space<vmem>>, %arg8: memref<64x384xf32, #tpu.memory_space<vmem>>, %arg9: memref<8x128xf32, #tpu.memory_space<vmem>>) attributes {dimension_semantics = [#tpu.dimension_semantics<parallel>, #tpu.dimension_semantics<arbitrary>], iteration_bounds = array<i64: 1, 1>, scalar_prefetch = 0 : i64, scratch_operands = 2 : i64, tpu.core_type = #tpu.core_type<tc>, window_params = [{transform_indices = @transform_0, window_bounds = array<i64: 8, 8, 4>}, {pipeline_mode = #tpu.pipeline_mode<synchronous>, transform_indices = @transform_1, window_bounds = array<i64: 4, 384>}, {pipeline_mode = #tpu.pipeline_mode<synchronous>, transform_indices = @transform_2, window_bounds = array<i64: 128, 384>}, {pipeline_mode = #tpu.pipeline_mode<synchronous>, transform_indices = @transform_3, window_bounds = array<i64: 1, 384>}, {pipeline_mode = #tpu.pipeline_mode<synchronous>, transform_indices = @transform_4, window_bounds = array<i64: 1, 128>}, {transform_indices = @transform_5, window_bounds = array<i64: 8, 128>}]} {
    %c0_i32 = arith.constant 0 : i32
    %0 = arith.cmpi eq, %arg1, %c0_i32 : i32
    %1 = arith.extui %0 : i1 to i32
    %c0_i32_0 = arith.constant 0 : i32
    %2 = arith.cmpi ne, %1, %c0_i32_0 : i32
    scf.if %2 {
      %cst_110 = arith.constant 0.000000e+00 : f32
      %297 = vector.broadcast %cst_110 : f32 to vector<8x128xf32>
      %c0_111 = arith.constant 0 : index
      %c0_112 = arith.constant 0 : index
      %298 = vector.load %arg9[%c0_111, %c0_112] : memref<8x128xf32, #tpu.memory_space<vmem>>, vector<8x128xf32>
      tpu.vector_store %arg9[%c0_111, %c0_112], %297 {strides = array<i32>} : memref<8x128xf32, #tpu.memory_space<vmem>>, vector<8x128xf32>,
    } else {
    }
    %c0 = arith.constant 0 : index
    %c0_1 = arith.constant 0 : index
    %c0_2 = arith.constant 0 : index
    %3 = vector.load %arg2[%c0, %c0_1, %c0_2] : memref<8x8x4xf32, #tpu.memory_space<vmem>>, vector<8x8x4xf32>
    %4 = vector.shape_cast %3 : vector<8x8x4xf32> to vector<64x4xf32>
    %c0_3 = arith.constant 0 : index
    %c0_4 = arith.constant 0 : index
    %5 = vector.load %arg3[%c0_3, %c0_4] : memref<4x384xf32, #tpu.memory_space<vmem>>, vector<4x384xf32>
    %cst = arith.constant dense<0.000000e+00> : vector<64x384xf32>
    %6 = tpu.matmul %4, %5, %cst {dimension_numbers = #tpu.dot_dimension_numbers<[1], [0], [0], [1], [0, 0, 1, 1], [], []>} : vector<64x4xf32>, vector<4x384xf32>, vector<64x384xf32> -> vector<64x384xf32>
    %c0_5 = arith.constant 0 : index
    %c0_6 = arith.constant 0 : index
    %7 = vector.load %arg5[%c0_5, %c0_6] : memref<1x384xf32, #tpu.memory_space<vmem>>, vector<1x384xf32>
    %8 = vector.broadcast %7 : vector<1x384xf32> to vector<64x384xf32>
    %9 = arith.addf %6, %8 : vector<64x384xf32>
    %c0_7 = arith.constant 0 : index
    %c0_8 = arith.constant 0 : index
    %10 = vector.load %arg8[%c0_7, %c0_8] : memref<64x384xf32, #tpu.memory_space<vmem>>, vector<64x384xf32>
    tpu.vector_store %arg8[%c0_7, %c0_8], %9 {strides = array<i32>} : memref<64x384xf32, #tpu.memory_space<vmem>>, vector<64x384xf32>,
    %c0_9 = arith.constant 0 : index
    %c0_10 = arith.constant 0 : index
    %11 = vector.load %arg6[%c0_9, %c0_10] : memref<1x128xf32, #tpu.memory_space<vmem>>, vector<1x128xf32>
    %12 = vector.shape_cast %11 : vector<1x128xf32> to vector<1x128xf32>
    %13 = vector.broadcast %12 : vector<1x128xf32> to vector<8x128xf32>
    %c0_i32_11 = arith.constant 0 : i32
    %c0_12 = arith.constant 0 : index
    %c0_13 = arith.constant 0 : index
    %14 = vector.load %arg9[%c0_12, %c0_13] : memref<8x128xf32, #tpu.memory_space<vmem>>, vector<8x128xf32>
    %c8_i32 = arith.constant 8 : i32
    %15 = arith.muli %c0_i32_11, %c8_i32 : i32
    %16 = tpu.assume_multiple %15, 8 : i32
    %17 = arith.index_cast %16 : i32 to index
    %c0_14 = arith.constant 0 : index
    %18 = vector.load %arg8[%17, %c0_14] : memref<64x384xf32, #tpu.memory_space<vmem>>, vector<8x384xf32>
    %c0_15 = arith.constant 0 : index
    %c0_16 = arith.constant 0 : index
    %19 = vector.load %arg4[%c0_15, %c0_16] : memref<128x384xf32, #tpu.memory_space<vmem>>, vector<128x384xf32>
    %cst_17 = arith.constant dense<0.000000e+00> : vector<8x384xf32>
    %20 = tpu.matmul %14, %19, %cst_17 {dimension_numbers = #tpu.dot_dimension_numbers<[1], [0], [0], [1], [0, 0, 1, 1], [], []>} : vector<8x128xf32>, vector<128x384xf32>, vector<8x384xf32> -> vector<8x384xf32>
    %21 = vector.extract_strided_slice %18 {offsets = [0, 0], sizes = [8, 128], strides = [1, 1]} : vector<8x384xf32> to vector<8x128xf32>
    %22 = vector.extract_strided_slice %20 {offsets = [0, 0], sizes = [8, 128], strides = [1, 1]} : vector<8x384xf32> to vector<8x128xf32>
    %23 = arith.addf %21, %22 : vector<8x128xf32>
    %24 = arith.negf %23 : vector<8x128xf32>
    %25 = math.exp %24 : vector<8x128xf32>
    %cst_18 = arith.constant 1.000000e+00 : f32
    %26 = vector.broadcast %cst_18 : f32 to vector<8x128xf32>
    %27 = arith.addf %26, %25 : vector<8x128xf32>
    %28 = arith.divf %26, %27 : vector<8x128xf32>
    %29 = vector.extract_strided_slice %18 {offsets = [0, 128], sizes = [8, 128], strides = [1, 1]} : vector<8x384xf32> to vector<8x128xf32>
    %30 = vector.extract_strided_slice %20 {offsets = [0, 128], sizes = [8, 128], strides = [1, 1]} : vector<8x384xf32> to vector<8x128xf32>
    %31 = arith.addf %29, %30 : vector<8x128xf32>
    %32 = arith.negf %31 : vector<8x128xf32>
    %33 = math.exp %32 : vector<8x128xf32>
    %cst_19 = arith.constant 1.000000e+00 : f32
    %34 = vector.broadcast %cst_19 : f32 to vector<8x128xf32>
    %35 = arith.addf %34, %33 : vector<8x128xf32>
    %36 = arith.divf %34, %35 : vector<8x128xf32>
    %37 = vector.extract_strided_slice %18 {offsets = [0, 256], sizes = [8, 128], strides = [1, 1]} : vector<8x384xf32> to vector<8x128xf32>
    %38 = vector.extract_strided_slice %20 {offsets = [0, 256], sizes = [8, 128], strides = [1, 1]} : vector<8x384xf32> to vector<8x128xf32>
    %39 = arith.addf %38, %13 : vector<8x128xf32>
    %40 = arith.mulf %28, %39 : vector<8x128xf32>
    %41 = arith.addf %37, %40 : vector<8x128xf32>
    %42 = math.tanh %41 : vector<8x128xf32>
    %cst_20 = arith.constant 1.000000e+00 : f32
    %43 = vector.broadcast %cst_20 : f32 to vector<8x128xf32>
    %44 = arith.subf %43, %36 : vector<8x128xf32>
    %45 = arith.mulf %44, %42 : vector<8x128xf32>
    %46 = arith.mulf %36, %14 : vector<8x128xf32>
    %47 = arith.addf %45, %46 : vector<8x128xf32>
    %c0_21 = arith.constant 0 : index
    %c0_22 = arith.constant 0 : index
    %48 = vector.load %arg9[%c0_21, %c0_22] : memref<8x128xf32, #tpu.memory_space<vmem>>, vector<8x128xf32>
    tpu.vector_store %arg9[%c0_21, %c0_22], %47 {strides = array<i32>} : memref<8x128xf32, #tpu.memory_space<vmem>>, vector<8x128xf32>,
    %c1_i32 = arith.constant 1 : i32
    %c0_23 = arith.constant 0 : index
    %c0_24 = arith.constant 0 : index
    %49 = vector.load %arg9[%c0_23, %c0_24] : memref<8x128xf32, #tpu.memory_space<vmem>>, vector<8x128xf32>
    %c8_i32_25 = arith.constant 8 : i32
    %50 = arith.muli %c1_i32, %c8_i32_25 : i32
    %51 = tpu.assume_multiple %50, 8 : i32
    %52 = arith.index_cast %51 : i32 to index
    %c0_26 = arith.constant 0 : index
    %53 = vector.load %arg8[%52, %c0_26] : memref<64x384xf32, #tpu.memory_space<vmem>>, vector<8x384xf32>
    %c0_27 = arith.constant 0 : index
    %c0_28 = arith.constant 0 : index
    %54 = vector.load %arg4[%c0_27, %c0_28] : memref<128x384xf32, #tpu.memory_space<vmem>>, vector<128x384xf32>
    %cst_29 = arith.constant dense<0.000000e+00> : vector<8x384xf32>
    %55 = tpu.matmul %49, %54, %cst_29 {dimension_numbers = #tpu.dot_dimension_numbers<[1], [0], [0], [1], [0, 0, 1, 1], [], []>} : vector<8x128xf32>, vector<128x384xf32>, vector<8x384xf32> -> vector<8x384xf32>
    %56 = vector.extract_strided_slice %53 {offsets = [0, 0], sizes = [8, 128], strides = [1, 1]} : vector<8x384xf32> to vector<8x128xf32>
    %57 = vector.extract_strided_slice %55 {offsets = [0, 0], sizes = [8, 128], strides = [1, 1]} : vector<8x384xf32> to vector<8x128xf32>
    %58 = arith.addf %56, %57 : vector<8x128xf32>
    %59 = arith.negf %58 : vector<8x128xf32>
    %60 = math.exp %59 : vector<8x128xf32>
    %cst_30 = arith.constant 1.000000e+00 : f32
    %61 = vector.broadcast %cst_30 : f32 to vector<8x128xf32>
    %62 = arith.addf %61, %60 : vector<8x128xf32>
    %63 = arith.divf %61, %62 : vector<8x128xf32>
    %64 = vector.extract_strided_slice %53 {offsets = [0, 128], sizes = [8, 128], strides = [1, 1]} : vector<8x384xf32> to vector<8x128xf32>
    %65 = vector.extract_strided_slice %55 {offsets = [0, 128], sizes = [8, 128], strides = [1, 1]} : vector<8x384xf32> to vector<8x128xf32>
    %66 = arith.addf %64, %65 : vector<8x128xf32>
    %67 = arith.negf %66 : vector<8x128xf32>
    %68 = math.exp %67 : vector<8x128xf32>
    %cst_31 = arith.constant 1.000000e+00 : f32
    %69 = vector.broadcast %cst_31 : f32 to vector<8x128xf32>
    %70 = arith.addf %69, %68 : vector<8x128xf32>
    %71 = arith.divf %69, %70 : vector<8x128xf32>
    %72 = vector.extract_strided_slice %53 {offsets = [0, 256], sizes = [8, 128], strides = [1, 1]} : vector<8x384xf32> to vector<8x128xf32>
    %73 = vector.extract_strided_slice %55 {offsets = [0, 256], sizes = [8, 128], strides = [1, 1]} : vector<8x384xf32> to vector<8x128xf32>
    %74 = arith.addf %73, %13 : vector<8x128xf32>
    %75 = arith.mulf %63, %74 : vector<8x128xf32>
    %76 = arith.addf %72, %75 : vector<8x128xf32>
    %77 = math.tanh %76 : vector<8x128xf32>
    %cst_32 = arith.constant 1.000000e+00 : f32
    %78 = vector.broadcast %cst_32 : f32 to vector<8x128xf32>
    %79 = arith.subf %78, %71 : vector<8x128xf32>
    %80 = arith.mulf %79, %77 : vector<8x128xf32>
    %81 = arith.mulf %71, %49 : vector<8x128xf32>
    %82 = arith.addf %80, %81 : vector<8x128xf32>
    %c0_33 = arith.constant 0 : index
    %c0_34 = arith.constant 0 : index
    %83 = vector.load %arg9[%c0_33, %c0_34] : memref<8x128xf32, #tpu.memory_space<vmem>>, vector<8x128xf32>
    tpu.vector_store %arg9[%c0_33, %c0_34], %82 {strides = array<i32>} : memref<8x128xf32, #tpu.memory_space<vmem>>, vector<8x128xf32>,
    %c2_i32 = arith.constant 2 : i32
    %c0_35 = arith.constant 0 : index
    %c0_36 = arith.constant 0 : index
    %84 = vector.load %arg9[%c0_35, %c0_36] : memref<8x128xf32, #tpu.memory_space<vmem>>, vector<8x128xf32>
    %c8_i32_37 = arith.constant 8 : i32
    %85 = arith.muli %c2_i32, %c8_i32_37 : i32
    %86 = tpu.assume_multiple %85, 8 : i32
    %87 = arith.index_cast %86 : i32 to index
    %c0_38 = arith.constant 0 : index
    %88 = vector.load %arg8[%87, %c0_38] : memref<64x384xf32, #tpu.memory_space<vmem>>, vector<8x384xf32>
    %c0_39 = arith.constant 0 : index
    %c0_40 = arith.constant 0 : index
    %89 = vector.load %arg4[%c0_39, %c0_40] : memref<128x384xf32, #tpu.memory_space<vmem>>, vector<128x384xf32>
    %cst_41 = arith.constant dense<0.000000e+00> : vector<8x384xf32>
    %90 = tpu.matmul %84, %89, %cst_41 {dimension_numbers = #tpu.dot_dimension_numbers<[1], [0], [0], [1], [0, 0, 1, 1], [], []>} : vector<8x128xf32>, vector<128x384xf32>, vector<8x384xf32> -> vector<8x384xf32>
    %91 = vector.extract_strided_slice %88 {offsets = [0, 0], sizes = [8, 128], strides = [1, 1]} : vector<8x384xf32> to vector<8x128xf32>
    %92 = vector.extract_strided_slice %90 {offsets = [0, 0], sizes = [8, 128], strides = [1, 1]} : vector<8x384xf32> to vector<8x128xf32>
    %93 = arith.addf %91, %92 : vector<8x128xf32>
    %94 = arith.negf %93 : vector<8x128xf32>
    %95 = math.exp %94 : vector<8x128xf32>
    %cst_42 = arith.constant 1.000000e+00 : f32
    %96 = vector.broadcast %cst_42 : f32 to vector<8x128xf32>
    %97 = arith.addf %96, %95 : vector<8x128xf32>
    %98 = arith.divf %96, %97 : vector<8x128xf32>
    %99 = vector.extract_strided_slice %88 {offsets = [0, 128], sizes = [8, 128], strides = [1, 1]} : vector<8x384xf32> to vector<8x128xf32>
    %100 = vector.extract_strided_slice %90 {offsets = [0, 128], sizes = [8, 128], strides = [1, 1]} : vector<8x384xf32> to vector<8x128xf32>
    %101 = arith.addf %99, %100 : vector<8x128xf32>
    %102 = arith.negf %101 : vector<8x128xf32>
    %103 = math.exp %102 : vector<8x128xf32>
    %cst_43 = arith.constant 1.000000e+00 : f32
    %104 = vector.broadcast %cst_43 : f32 to vector<8x128xf32>
    %105 = arith.addf %104, %103 : vector<8x128xf32>
    %106 = arith.divf %104, %105 : vector<8x128xf32>
    %107 = vector.extract_strided_slice %88 {offsets = [0, 256], sizes = [8, 128], strides = [1, 1]} : vector<8x384xf32> to vector<8x128xf32>
    %108 = vector.extract_strided_slice %90 {offsets = [0, 256], sizes = [8, 128], strides = [1, 1]} : vector<8x384xf32> to vector<8x128xf32>
    %109 = arith.addf %108, %13 : vector<8x128xf32>
    %110 = arith.mulf %98, %109 : vector<8x128xf32>
    %111 = arith.addf %107, %110 : vector<8x128xf32>
    %112 = math.tanh %111 : vector<8x128xf32>
    %cst_44 = arith.constant 1.000000e+00 : f32
    %113 = vector.broadcast %cst_44 : f32 to vector<8x128xf32>
    %114 = arith.subf %113, %106 : vector<8x128xf32>
    %115 = arith.mulf %114, %112 : vector<8x128xf32>
    %116 = arith.mulf %106, %84 : vector<8x128xf32>
    %117 = arith.addf %115, %116 : vector<8x128xf32>
    %c0_45 = arith.constant 0 : index
    %c0_46 = arith.constant 0 : index
    %118 = vector.load %arg9[%c0_45, %c0_46] : memref<8x128xf32, #tpu.memory_space<vmem>>, vector<8x128xf32>
    tpu.vector_store %arg9[%c0_45, %c0_46], %117 {strides = array<i32>} : memref<8x128xf32, #tpu.memory_space<vmem>>, vector<8x128xf32>,
    %c3_i32 = arith.constant 3 : i32
    %c0_47 = arith.constant 0 : index
    %c0_48 = arith.constant 0 : index
    %119 = vector.load %arg9[%c0_47, %c0_48] : memref<8x128xf32, #tpu.memory_space<vmem>>, vector<8x128xf32>
    %c8_i32_49 = arith.constant 8 : i32
    %120 = arith.muli %c3_i32, %c8_i32_49 : i32
    %121 = tpu.assume_multiple %120, 8 : i32
    %122 = arith.index_cast %121 : i32 to index
    %c0_50 = arith.constant 0 : index
    %123 = vector.load %arg8[%122, %c0_50] : memref<64x384xf32, #tpu.memory_space<vmem>>, vector<8x384xf32>
    %c0_51 = arith.constant 0 : index
    %c0_52 = arith.constant 0 : index
    %124 = vector.load %arg4[%c0_51, %c0_52] : memref<128x384xf32, #tpu.memory_space<vmem>>, vector<128x384xf32>
    %cst_53 = arith.constant dense<0.000000e+00> : vector<8x384xf32>
    %125 = tpu.matmul %119, %124, %cst_53 {dimension_numbers = #tpu.dot_dimension_numbers<[1], [0], [0], [1], [0, 0, 1, 1], [], []>} : vector<8x128xf32>, vector<128x384xf32>, vector<8x384xf32> -> vector<8x384xf32>
    %126 = vector.extract_strided_slice %123 {offsets = [0, 0], sizes = [8, 128], strides = [1, 1]} : vector<8x384xf32> to vector<8x128xf32>
    %127 = vector.extract_strided_slice %125 {offsets = [0, 0], sizes = [8, 128], strides = [1, 1]} : vector<8x384xf32> to vector<8x128xf32>
    %128 = arith.addf %126, %127 : vector<8x128xf32>
    %129 = arith.negf %128 : vector<8x128xf32>
    %130 = math.exp %129 : vector<8x128xf32>
    %cst_54 = arith.constant 1.000000e+00 : f32
    %131 = vector.broadcast %cst_54 : f32 to vector<8x128xf32>
    %132 = arith.addf %131, %130 : vector<8x128xf32>
    %133 = arith.divf %131, %132 : vector<8x128xf32>
    %134 = vector.extract_strided_slice %123 {offsets = [0, 128], sizes = [8, 128], strides = [1, 1]} : vector<8x384xf32> to vector<8x128xf32>
    %135 = vector.extract_strided_slice %125 {offsets = [0, 128], sizes = [8, 128], strides = [1, 1]} : vector<8x384xf32> to vector<8x128xf32>
    %136 = arith.addf %134, %135 : vector<8x128xf32>
    %137 = arith.negf %136 : vector<8x128xf32>
    %138 = math.exp %137 : vector<8x128xf32>
    %cst_55 = arith.constant 1.000000e+00 : f32
    %139 = vector.broadcast %cst_55 : f32 to vector<8x128xf32>
    %140 = arith.addf %139, %138 : vector<8x128xf32>
    %141 = arith.divf %139, %140 : vector<8x128xf32>
    %142 = vector.extract_strided_slice %123 {offsets = [0, 256], sizes = [8, 128], strides = [1, 1]} : vector<8x384xf32> to vector<8x128xf32>
    %143 = vector.extract_strided_slice %125 {offsets = [0, 256], sizes = [8, 128], strides = [1, 1]} : vector<8x384xf32> to vector<8x128xf32>
    %144 = arith.addf %143, %13 : vector<8x128xf32>
    %145 = arith.mulf %133, %144 : vector<8x128xf32>
    %146 = arith.addf %142, %145 : vector<8x128xf32>
    %147 = math.tanh %146 : vector<8x128xf32>
    %cst_56 = arith.constant 1.000000e+00 : f32
    %148 = vector.broadcast %cst_56 : f32 to vector<8x128xf32>
    %149 = arith.subf %148, %141 : vector<8x128xf32>
    %150 = arith.mulf %149, %147 : vector<8x128xf32>
    %151 = arith.mulf %141, %119 : vector<8x128xf32>
    %152 = arith.addf %150, %151 : vector<8x128xf32>
    %c0_57 = arith.constant 0 : index
    %c0_58 = arith.constant 0 : index
    %153 = vector.load %arg9[%c0_57, %c0_58] : memref<8x128xf32, #tpu.memory_space<vmem>>, vector<8x128xf32>
    tpu.vector_store %arg9[%c0_57, %c0_58], %152 {strides = array<i32>} : memref<8x128xf32, #tpu.memory_space<vmem>>, vector<8x128xf32>,
    %c4_i32 = arith.constant 4 : i32
    %c0_59 = arith.constant 0 : index
    %c0_60 = arith.constant 0 : index
    %154 = vector.load %arg9[%c0_59, %c0_60] : memref<8x128xf32, #tpu.memory_space<vmem>>, vector<8x128xf32>
    %c8_i32_61 = arith.constant 8 : i32
    %155 = arith.muli %c4_i32, %c8_i32_61 : i32
    %156 = tpu.assume_multiple %155, 8 : i32
    %157 = arith.index_cast %156 : i32 to index
    %c0_62 = arith.constant 0 : index
    %158 = vector.load %arg8[%157, %c0_62] : memref<64x384xf32, #tpu.memory_space<vmem>>, vector<8x384xf32>
    %c0_63 = arith.constant 0 : index
    %c0_64 = arith.constant 0 : index
    %159 = vector.load %arg4[%c0_63, %c0_64] : memref<128x384xf32, #tpu.memory_space<vmem>>, vector<128x384xf32>
    %cst_65 = arith.constant dense<0.000000e+00> : vector<8x384xf32>
    %160 = tpu.matmul %154, %159, %cst_65 {dimension_numbers = #tpu.dot_dimension_numbers<[1], [0], [0], [1], [0, 0, 1, 1], [], []>} : vector<8x128xf32>, vector<128x384xf32>, vector<8x384xf32> -> vector<8x384xf32>
    %161 = vector.extract_strided_slice %158 {offsets = [0, 0], sizes = [8, 128], strides = [1, 1]} : vector<8x384xf32> to vector<8x128xf32>
    %162 = vector.extract_strided_slice %160 {offsets = [0, 0], sizes = [8, 128], strides = [1, 1]} : vector<8x384xf32> to vector<8x128xf32>
    %163 = arith.addf %161, %162 : vector<8x128xf32>
    %164 = arith.negf %163 : vector<8x128xf32>
    %165 = math.exp %164 : vector<8x128xf32>
    %cst_66 = arith.constant 1.000000e+00 : f32
    %166 = vector.broadcast %cst_66 : f32 to vector<8x128xf32>
    %167 = arith.addf %166, %165 : vector<8x128xf32>
    %168 = arith.divf %166, %167 : vector<8x128xf32>
    %169 = vector.extract_strided_slice %158 {offsets = [0, 128], sizes = [8, 128], strides = [1, 1]} : vector<8x384xf32> to vector<8x128xf32>
    %170 = vector.extract_strided_slice %160 {offsets = [0, 128], sizes = [8, 128], strides = [1, 1]} : vector<8x384xf32> to vector<8x128xf32>
    %171 = arith.addf %169, %170 : vector<8x128xf32>
    %172 = arith.negf %171 : vector<8x128xf32>
    %173 = math.exp %172 : vector<8x128xf32>
    %cst_67 = arith.constant 1.000000e+00 : f32
    %174 = vector.broadcast %cst_67 : f32 to vector<8x128xf32>
    %175 = arith.addf %174, %173 : vector<8x128xf32>
    %176 = arith.divf %174, %175 : vector<8x128xf32>
    %177 = vector.extract_strided_slice %158 {offsets = [0, 256], sizes = [8, 128], strides = [1, 1]} : vector<8x384xf32> to vector<8x128xf32>
    %178 = vector.extract_strided_slice %160 {offsets = [0, 256], sizes = [8, 128], strides = [1, 1]} : vector<8x384xf32> to vector<8x128xf32>
    %179 = arith.addf %178, %13 : vector<8x128xf32>
    %180 = arith.mulf %168, %179 : vector<8x128xf32>
    %181 = arith.addf %177, %180 : vector<8x128xf32>
    %182 = math.tanh %181 : vector<8x128xf32>
    %cst_68 = arith.constant 1.000000e+00 : f32
    %183 = vector.broadcast %cst_68 : f32 to vector<8x128xf32>
    %184 = arith.subf %183, %176 : vector<8x128xf32>
    %185 = arith.mulf %184, %182 : vector<8x128xf32>
    %186 = arith.mulf %176, %154 : vector<8x128xf32>
    %187 = arith.addf %185, %186 : vector<8x128xf32>
    %c0_69 = arith.constant 0 : index
    %c0_70 = arith.constant 0 : index
    %188 = vector.load %arg9[%c0_69, %c0_70] : memref<8x128xf32, #tpu.memory_space<vmem>>, vector<8x128xf32>
    tpu.vector_store %arg9[%c0_69, %c0_70], %187 {strides = array<i32>} : memref<8x128xf32, #tpu.memory_space<vmem>>, vector<8x128xf32>,
    %c5_i32 = arith.constant 5 : i32
    %c0_71 = arith.constant 0 : index
    %c0_72 = arith.constant 0 : index
    %189 = vector.load %arg9[%c0_71, %c0_72] : memref<8x128xf32, #tpu.memory_space<vmem>>, vector<8x128xf32>
    %c8_i32_73 = arith.constant 8 : i32
    %190 = arith.muli %c5_i32, %c8_i32_73 : i32
    %191 = tpu.assume_multiple %190, 8 : i32
    %192 = arith.index_cast %191 : i32 to index
    %c0_74 = arith.constant 0 : index
    %193 = vector.load %arg8[%192, %c0_74] : memref<64x384xf32, #tpu.memory_space<vmem>>, vector<8x384xf32>
    %c0_75 = arith.constant 0 : index
    %c0_76 = arith.constant 0 : index
    %194 = vector.load %arg4[%c0_75, %c0_76] : memref<128x384xf32, #tpu.memory_space<vmem>>, vector<128x384xf32>
    %cst_77 = arith.constant dense<0.000000e+00> : vector<8x384xf32>
    %195 = tpu.matmul %189, %194, %cst_77 {dimension_numbers = #tpu.dot_dimension_numbers<[1], [0], [0], [1], [0, 0, 1, 1], [], []>} : vector<8x128xf32>, vector<128x384xf32>, vector<8x384xf32> -> vector<8x384xf32>
    %196 = vector.extract_strided_slice %193 {offsets = [0, 0], sizes = [8, 128], strides = [1, 1]} : vector<8x384xf32> to vector<8x128xf32>
    %197 = vector.extract_strided_slice %195 {offsets = [0, 0], sizes = [8, 128], strides = [1, 1]} : vector<8x384xf32> to vector<8x128xf32>
    %198 = arith.addf %196, %197 : vector<8x128xf32>
    %199 = arith.negf %198 : vector<8x128xf32>
    %200 = math.exp %199 : vector<8x128xf32>
    %cst_78 = arith.constant 1.000000e+00 : f32
    %201 = vector.broadcast %cst_78 : f32 to vector<8x128xf32>
    %202 = arith.addf %201, %200 : vector<8x128xf32>
    %203 = arith.divf %201, %202 : vector<8x128xf32>
    %204 = vector.extract_strided_slice %193 {offsets = [0, 128], sizes = [8, 128], strides = [1, 1]} : vector<8x384xf32> to vector<8x128xf32>
    %205 = vector.extract_strided_slice %195 {offsets = [0, 128], sizes = [8, 128], strides = [1, 1]} : vector<8x384xf32> to vector<8x128xf32>
    %206 = arith.addf %204, %205 : vector<8x128xf32>
    %207 = arith.negf %206 : vector<8x128xf32>
    %208 = math.exp %207 : vector<8x128xf32>
    %cst_79 = arith.constant 1.000000e+00 : f32
    %209 = vector.broadcast %cst_79 : f32 to vector<8x128xf32>
    %210 = arith.addf %209, %208 : vector<8x128xf32>
    %211 = arith.divf %209, %210 : vector<8x128xf32>
    %212 = vector.extract_strided_slice %193 {offsets = [0, 256], sizes = [8, 128], strides = [1, 1]} : vector<8x384xf32> to vector<8x128xf32>
    %213 = vector.extract_strided_slice %195 {offsets = [0, 256], sizes = [8, 128], strides = [1, 1]} : vector<8x384xf32> to vector<8x128xf32>
    %214 = arith.addf %213, %13 : vector<8x128xf32>
    %215 = arith.mulf %203, %214 : vector<8x128xf32>
    %216 = arith.addf %212, %215 : vector<8x128xf32>
    %217 = math.tanh %216 : vector<8x128xf32>
    %cst_80 = arith.constant 1.000000e+00 : f32
    %218 = vector.broadcast %cst_80 : f32 to vector<8x128xf32>
    %219 = arith.subf %218, %211 : vector<8x128xf32>
    %220 = arith.mulf %219, %217 : vector<8x128xf32>
    %221 = arith.mulf %211, %189 : vector<8x128xf32>
    %222 = arith.addf %220, %221 : vector<8x128xf32>
    %c0_81 = arith.constant 0 : index
    %c0_82 = arith.constant 0 : index
    %223 = vector.load %arg9[%c0_81, %c0_82] : memref<8x128xf32, #tpu.memory_space<vmem>>, vector<8x128xf32>
    tpu.vector_store %arg9[%c0_81, %c0_82], %222 {strides = array<i32>} : memref<8x128xf32, #tpu.memory_space<vmem>>, vector<8x128xf32>,
    %c6_i32 = arith.constant 6 : i32
    %c0_83 = arith.constant 0 : index
    %c0_84 = arith.constant 0 : index
    %224 = vector.load %arg9[%c0_83, %c0_84] : memref<8x128xf32, #tpu.memory_space<vmem>>, vector<8x128xf32>
    %c8_i32_85 = arith.constant 8 : i32
    %225 = arith.muli %c6_i32, %c8_i32_85 : i32
    %226 = tpu.assume_multiple %225, 8 : i32
    %227 = arith.index_cast %226 : i32 to index
    %c0_86 = arith.constant 0 : index
    %228 = vector.load %arg8[%227, %c0_86] : memref<64x384xf32, #tpu.memory_space<vmem>>, vector<8x384xf32>
    %c0_87 = arith.constant 0 : index
    %c0_88 = arith.constant 0 : index
    %229 = vector.load %arg4[%c0_87, %c0_88] : memref<128x384xf32, #tpu.memory_space<vmem>>, vector<128x384xf32>
    %cst_89 = arith.constant dense<0.000000e+00> : vector<8x384xf32>
    %230 = tpu.matmul %224, %229, %cst_89 {dimension_numbers = #tpu.dot_dimension_numbers<[1], [0], [0], [1], [0, 0, 1, 1], [], []>} : vector<8x128xf32>, vector<128x384xf32>, vector<8x384xf32> -> vector<8x384xf32>
    %231 = vector.extract_strided_slice %228 {offsets = [0, 0], sizes = [8, 128], strides = [1, 1]} : vector<8x384xf32> to vector<8x128xf32>
    %232 = vector.extract_strided_slice %230 {offsets = [0, 0], sizes = [8, 128], strides = [1, 1]} : vector<8x384xf32> to vector<8x128xf32>
    %233 = arith.addf %231, %232 : vector<8x128xf32>
    %234 = arith.negf %233 : vector<8x128xf32>
    %235 = math.exp %234 : vector<8x128xf32>
    %cst_90 = arith.constant 1.000000e+00 : f32
    %236 = vector.broadcast %cst_90 : f32 to vector<8x128xf32>
    %237 = arith.addf %236, %235 : vector<8x128xf32>
    %238 = arith.divf %236, %237 : vector<8x128xf32>
    %239 = vector.extract_strided_slice %228 {offsets = [0, 128], sizes = [8, 128], strides = [1, 1]} : vector<8x384xf32> to vector<8x128xf32>
    %240 = vector.extract_strided_slice %230 {offsets = [0, 128], sizes = [8, 128], strides = [1, 1]} : vector<8x384xf32> to vector<8x128xf32>
    %241 = arith.addf %239, %240 : vector<8x128xf32>
    %242 = arith.negf %241 : vector<8x128xf32>
    %243 = math.exp %242 : vector<8x128xf32>
    %cst_91 = arith.constant 1.000000e+00 : f32
    %244 = vector.broadcast %cst_91 : f32 to vector<8x128xf32>
    %245 = arith.addf %244, %243 : vector<8x128xf32>
    %246 = arith.divf %244, %245 : vector<8x128xf32>
    %247 = vector.extract_strided_slice %228 {offsets = [0, 256], sizes = [8, 128], strides = [1, 1]} : vector<8x384xf32> to vector<8x128xf32>
    %248 = vector.extract_strided_slice %230 {offsets = [0, 256], sizes = [8, 128], strides = [1, 1]} : vector<8x384xf32> to vector<8x128xf32>
    %249 = arith.addf %248, %13 : vector<8x128xf32>
    %250 = arith.mulf %238, %249 : vector<8x128xf32>
    %251 = arith.addf %247, %250 : vector<8x128xf32>
    %252 = math.tanh %251 : vector<8x128xf32>
    %cst_92 = arith.constant 1.000000e+00 : f32
    %253 = vector.broadcast %cst_92 : f32 to vector<8x128xf32>
    %254 = arith.subf %253, %246 : vector<8x128xf32>
    %255 = arith.mulf %254, %252 : vector<8x128xf32>
    %256 = arith.mulf %246, %224 : vector<8x128xf32>
    %257 = arith.addf %255, %256 : vector<8x128xf32>
    %c0_93 = arith.constant 0 : index
    %c0_94 = arith.constant 0 : index
    %258 = vector.load %arg9[%c0_93, %c0_94] : memref<8x128xf32, #tpu.memory_space<vmem>>, vector<8x128xf32>
    tpu.vector_store %arg9[%c0_93, %c0_94], %257 {strides = array<i32>} : memref<8x128xf32, #tpu.memory_space<vmem>>, vector<8x128xf32>,
    %c7_i32 = arith.constant 7 : i32
    %c0_95 = arith.constant 0 : index
    %c0_96 = arith.constant 0 : index
    %259 = vector.load %arg9[%c0_95, %c0_96] : memref<8x128xf32, #tpu.memory_space<vmem>>, vector<8x128xf32>
    %c8_i32_97 = arith.constant 8 : i32
    %260 = arith.muli %c7_i32, %c8_i32_97 : i32
    %261 = tpu.assume_multiple %260, 8 : i32
    %262 = arith.index_cast %261 : i32 to index
    %c0_98 = arith.constant 0 : index
    %263 = vector.load %arg8[%262, %c0_98] : memref<64x384xf32, #tpu.memory_space<vmem>>, vector<8x384xf32>
    %c0_99 = arith.constant 0 : index
    %c0_100 = arith.constant 0 : index
    %264 = vector.load %arg4[%c0_99, %c0_100] : memref<128x384xf32, #tpu.memory_space<vmem>>, vector<128x384xf32>
    %cst_101 = arith.constant dense<0.000000e+00> : vector<8x384xf32>
    %265 = tpu.matmul %259, %264, %cst_101 {dimension_numbers = #tpu.dot_dimension_numbers<[1], [0], [0], [1], [0, 0, 1, 1], [], []>} : vector<8x128xf32>, vector<128x384xf32>, vector<8x384xf32> -> vector<8x384xf32>
    %266 = vector.extract_strided_slice %263 {offsets = [0, 0], sizes = [8, 128], strides = [1, 1]} : vector<8x384xf32> to vector<8x128xf32>
    %267 = vector.extract_strided_slice %265 {offsets = [0, 0], sizes = [8, 128], strides = [1, 1]} : vector<8x384xf32> to vector<8x128xf32>
    %268 = arith.addf %266, %267 : vector<8x128xf32>
    %269 = arith.negf %268 : vector<8x128xf32>
    %270 = math.exp %269 : vector<8x128xf32>
    %cst_102 = arith.constant 1.000000e+00 : f32
    %271 = vector.broadcast %cst_102 : f32 to vector<8x128xf32>
    %272 = arith.addf %271, %270 : vector<8x128xf32>
    %273 = arith.divf %271, %272 : vector<8x128xf32>
    %274 = vector.extract_strided_slice %263 {offsets = [0, 128], sizes = [8, 128], strides = [1, 1]} : vector<8x384xf32> to vector<8x128xf32>
    %275 = vector.extract_strided_slice %265 {offsets = [0, 128], sizes = [8, 128], strides = [1, 1]} : vector<8x384xf32> to vector<8x128xf32>
    %276 = arith.addf %274, %275 : vector<8x128xf32>
    %277 = arith.negf %276 : vector<8x128xf32>
    %278 = math.exp %277 : vector<8x128xf32>
    %cst_103 = arith.constant 1.000000e+00 : f32
    %279 = vector.broadcast %cst_103 : f32 to vector<8x128xf32>
    %280 = arith.addf %279, %278 : vector<8x128xf32>
    %281 = arith.divf %279, %280 : vector<8x128xf32>
    %282 = vector.extract_strided_slice %263 {offsets = [0, 256], sizes = [8, 128], strides = [1, 1]} : vector<8x384xf32> to vector<8x128xf32>
    %283 = vector.extract_strided_slice %265 {offsets = [0, 256], sizes = [8, 128], strides = [1, 1]} : vector<8x384xf32> to vector<8x128xf32>
    %284 = arith.addf %283, %13 : vector<8x128xf32>
    %285 = arith.mulf %273, %284 : vector<8x128xf32>
    %286 = arith.addf %282, %285 : vector<8x128xf32>
    %287 = math.tanh %286 : vector<8x128xf32>
    %cst_104 = arith.constant 1.000000e+00 : f32
    %288 = vector.broadcast %cst_104 : f32 to vector<8x128xf32>
    %289 = arith.subf %288, %281 : vector<8x128xf32>
    %290 = arith.mulf %289, %287 : vector<8x128xf32>
    %291 = arith.mulf %281, %259 : vector<8x128xf32>
    %292 = arith.addf %290, %291 : vector<8x128xf32>
    %c0_105 = arith.constant 0 : index
    %c0_106 = arith.constant 0 : index
    %293 = vector.load %arg9[%c0_105, %c0_106] : memref<8x128xf32, #tpu.memory_space<vmem>>, vector<8x128xf32>
    tpu.vector_store %arg9[%c0_105, %c0_106], %292 {strides = array<i32>} : memref<8x128xf32, #tpu.memory_space<vmem>>, vector<8x128xf32>,
    %c8_i32_107 = arith.constant 8 : i32
    %c0_i32_108 = arith.constant 0 : i32
    %294 = arith.cmpi eq, %arg1, %c0_i32_108 : i32
    %295 = arith.extui %294 : i1 to i32
    %c0_i32_109 = arith.constant 0 : i32
    %296 = arith.cmpi ne, %295, %c0_i32_109 : i32
    scf.if %296 {
      %c0_110 = arith.constant 0 : index
      %c0_111 = arith.constant 0 : index
      %297 = vector.load %arg9[%c0_110, %c0_111] : memref<8x128xf32, #tpu.memory_space<vmem>>, vector<8x128xf32>
      %c0_112 = arith.constant 0 : index
      %c0_113 = arith.constant 0 : index
      %298 = vector.load %arg7[%c0_112, %c0_113] : memref<8x128xf32, #tpu.memory_space<vmem>>, vector<8x128xf32>
      tpu.vector_store %arg7[%c0_112, %c0_113], %297 {strides = array<i32>} : memref<8x128xf32, #tpu.memory_space<vmem>>, vector<8x128xf32>,
    } else {
    }
    return
  }
  func.func @transform_0(%arg0: i32, %arg1: i32) -> (i32, i32, i32) {
    %c0_i32 = arith.constant 0 : i32
    %c0_i32_0 = arith.constant 0 : i32
    return %arg1, %arg0, %c0_i32 : i32, i32, i32
  }
  func.func @transform_1(%arg0: i32, %arg1: i32) -> (i32, i32) {
    %c0_i32 = arith.constant 0 : i32
    %c0_i32_0 = arith.constant 0 : i32
    %c0_i32_1 = arith.constant 0 : i32
    return %c0_i32, %c0_i32_0 : i32, i32
  }
  func.func @transform_2(%arg0: i32, %arg1: i32) -> (i32, i32) {
    %c0_i32 = arith.constant 0 : i32
    %c0_i32_0 = arith.constant 0 : i32
    %c0_i32_1 = arith.constant 0 : i32
    return %c0_i32, %c0_i32_0 : i32, i32
  }
  func.func @transform_3(%arg0: i32, %arg1: i32) -> (i32, i32) {
    %c0_i32 = arith.constant 0 : i32
    %c0_i32_0 = arith.constant 0 : i32
    %c0_i32_1 = arith.constant 0 : i32
    return %c0_i32, %c0_i32_0 : i32, i32
  }
  func.func @transform_4(%arg0: i32, %arg1: i32) -> (i32, i32) {
    %c0_i32 = arith.constant 0 : i32
    %c0_i32_0 = arith.constant 0 : i32
    %c0_i32_1 = arith.constant 0 : i32
    return %c0_i32, %c0_i32_0 : i32, i32
  }
  func.func @transform_5(%arg0: i32, %arg1: i32) -> (i32, i32) {
    %c0_i32 = arith.constant 0 : i32
    %c0_i32_0 = arith.constant 0 : i32
    return %arg0, %c0_i32 : i32, i32
  }
}

</mosaic_0001>

<bundles_post_ra>
// kernel: tpu_custom_call.1
= control target key start
LH: loop header
LB: loop body
LE: loop exit
PB: predicated region body
PF: predicated region fallthrough
CT: control target
= control target key end

     0   :  { %10 = vsyncpa [#allocation5], 0  ;;  %s3785_s0 = inlined_call_operand.vmem [shape: f32[8,8,4], index: 0, kind: input, shape index: {}]   ;;  %s3786_s1 = inlined_call_operand.vmem [shape: f32[4,384], index: 1, kind: input, shape index: {}]   ;;  %s3787_s2 = inlined_call_operand.hbm [shape: f32[128,384], index: 2, kind: input, shape index: {}]   ;;  %s3788_s3 = inlined_call_operand.vmem [shape: f32[1,384], index: 3, kind: input, shape index: {}]   ;;  %s3789_s4 = inlined_call_operand.vmem [shape: f32[1,128], index: 4, kind: input, shape index: {}]   ;;  %s3790_s5 = inlined_call_operand.hbm [shape: f32[8,128], index: 5, kind: output, shape index: {}]  }
   0x1   :  { %11 = vsyncpa [#allocation6], 0  ;;  %s3221_s18 = smov [#allocation4]   ;;  %s3173_s22 = scalar_lea.hbm %s3787_s2, 6144 }
   0x2   :  { %s21_s19 = sshll.u32 %s3221_s18, 4  ;;  %p3174_p0 = scmp.ne.s32.totalorder %s3787_s2, %s3173_s22  ;;  %s22_s19 = int_to_ptr.vmem [resolvable:$true] %s21_s19 }
   0x3   :  { %p3177_p1 = scmp.lt.u32.totalorder %s3173_s22, %s3787_s2 }
   0x5   :  { %p3179_p2 = pnand %p3177_p1, %p3174_p0 }
   0x7   :  { %3182 = shalt.err (!%p3179_p2)
}
   0x8   :  { %s3183_s27 = scalar_lea.vmem %s22_s19, 6144  ;;  %p3188_p4 = scmp.lt.s32.totalorder %s22_s19, %s22_s19 }
   0x9   :  { %p3184_p3 = scmp.ne.s32.totalorder %s22_s19, %s3183_s27  ;;  %p3189_p5 = scmp.lt.s32.totalorder %s3183_s27, %s3183_s27 }
   0xb   :  { %p3190_p6 = por %p3189_p5, %p3188_p4 }
   0xd   :  { %p3191_p7 = pnand %p3190_p6, %p3184_p3 }
   0xf   :  { %3194 = shalt.err (!%p3191_p7)
}
  0x10   :  { %s3222_s28 = smov 384   ;;  %s3223_s29 = smov 24  }
  0x11   :  { %27 = dma.hbm_to_vmem [thread:$0]  %s3787_s2, 6144, %s22_s19, [#allocation5], %s3222_s28, %s3222_s28, %s3223_s29  }
  0x12   :  { %3217 = dma.done.wait [#allocation5], 6144  }
  0x13   :  { %3218 = vsyncadd [#allocation5], 4294961152  ;;  %v3224_v0 = vmov 0.0   ;;  %v48_v1 = vld [vmem:[%s3786_s1] sm:$0xff]  ;;  %vm95_vm0 = vcmask 1043456   ;;  %vm70_vm1 = vcmask 31744  }
  0x14   :  { %166 = vmatprep.mubr.f32.mxu0 %v3224_v0  ;;  %v40_v2 = vld [vmem:[%s3785_s0] sm:$0xff]  ;;  %v359_v3 = vld [vmem:[#allocation4 + $0x8] sm:$0xff]  ;;  %v69_v4 = vcombine.high %v48_v1, %v48_v1  ;;  %v361_v7 = vld [vmem:[#allocation4 + $0x18] sm:$0xff]  ;;  %v3225_v34 = vmov 0.0|0.0   ;;  %vm3226_vm2 = vmmov 0  }
  0x15   :  { %v362_v5 = vld [vmem:[#allocation4 + $0x20] sm:$0xff]  ;;  %2313 = vmatprep.mubr.msk.f32.mxu1 %vm70_vm1, %v40_v2  ;;  %v365_v10 = vld [vmem:[#allocation4 + $0x38] sm:$0xff]  ;;  %v368_v11 = vld [vmem:[#allocation4 + $0x50] sm:$0xff] }
  0x16   :  { %v358_v6 = vld [vmem:[#allocation4] sm:$0xff]  ;;  %v3278_v8 = vpack.c.bf16 %v362_v5, %v359_v3  ;;  %2130 = vmatprep.subr.msk.mxu0 %vm95_vm0, %v69_v4  ;;  %v3283_v12 = vpack.c.bf16 %v368_v11, %v365_v10  ;;  %v364_v13 = vld [vmem:[#allocation4 + $0x30] sm:$0xff]  ;;  %v367_v14 = vld [vmem:[#allocation4 + $0x48] sm:$0xff] }
  0x17   :  { %v3280_v9 = vpack.c.bf16 %v361_v7, %v358_v6  ;;  %2131 = vmatpush1.msk.msra.mxu0 %vm95_vm0, %v48_v1  ;;  %v371_v15 = vld [vmem:[#allocation4 + $0x68] sm:$0xff]  ;;  %v374_v16 = vld [vmem:[#allocation4 + $0x80] sm:$0xff]  ;;  %v3293_v18 = vpack.c.bf16 %v367_v14, %v364_v13  ;;  %v373_v21 = vld [vmem:[#allocation4 + $0x78] sm:$0xff] }
  0x18   :  { %2132 = vmatmul.mubr.msk.f32.vlgmr.msra.gmra.mrb[0].mxu0 %vm70_vm1, %v40_v2  ;;  %2606 = vmatprep.subr.bf16.mxu0 %v3278_v8  ;;  %v41_v17 = vld [vmem:[%s3785_s0 + $0x8] sm:$0xff]  ;;  %v3296_v19 = vpack.c.bf16 %v374_v16, %v371_v15  ;;  %v370_v20 = vld [vmem:[#allocation4 + $0x60] sm:$0xff]  ;;  %v377_v22 = vld [vmem:[#allocation4 + $0x98] sm:$0xff] }
  0x19   :  { %2608 = vmatpush1.bf16.msra.mxu0 %v3280_v9  ;;  %172 = vmatprep.mubr.f32.mxu0 %v3224_v0  ;;  %v380_v23 = vld [vmem:[#allocation4 + $0xb0] sm:$0xff]  ;;  %v3304_v25 = vpack.c.bf16 %v373_v21, %v370_v20  ;;  %v49_v26 = vld [vmem:[%s3786_s1 + $0x8] sm:$0xf]  ;;  %v386_v31 = vld [vmem:[#allocation4 + $0xe0] sm:$0xff] }
  0x1a   :  { %2610 = vmatprep.subr.bf16.mxu0 %v3283_v12  ;;  %v42_v24 = vld [vmem:[%s3785_s0 + $0x10] sm:$0xff]  ;;  %v3310_v27 = vpack.c.bf16 %v380_v23, %v377_v22  ;;  %v379_v29 = vld [vmem:[#allocation4 + $0xa8] sm:$0xff]  ;;  %2311 = vmatprep.subr.msk.mxu1 %vm95_vm0, %v49_v26  ;;  %v43_v36 = vld [vmem:[%s3785_s0 + $0x18] sm:$0xff] }
  0x1b   :  { %v376_v28 = vld [vmem:[#allocation4 + $0x90] sm:$0xff]  ;;  %v383_v30 = vld [vmem:[#allocation4 + $0xc8] sm:$0xff]  ;;  %2312 = vmatpush3.msk.msra.mxu1 %vm95_vm0, %v49_v26  ;;  %v366_v38 = vld [vmem:[#allocation4 + $0x40] sm:$0xff] }
  0x1c   :  { %2133 = vmatmul.mubr.msk.f32.gmra.mrb[2].mxu0 %vm70_vm1, %v41_v17  ;;  %v360_v32 = vld [vmem:[#allocation4 + $0x10] sm:$0xff]  ;;  %v363_v33 = vld [vmem:[#allocation4 + $0x28] sm:$0xff]  ;;  %2637 = vmatprep.subr.bf16.mxu1 %v3225_v34  ;;  %v3323_v37 = vpack.c.bf16 %v379_v29, %v376_v28  ;;  %v3326_v39 = vpack.c.bf16 %v386_v31, %v383_v30  ;;  %v382_v40 = vld [vmem:[#allocation4 + $0xc0] sm:$0xff]  ;;  %v52_v29 = vlaneseq }
  0x1d   :  { %2612 = vmatpush1.bf16.msra.mxu0 %v3293_v18  ;;  %178 = vmatprep.mubr.f32.mxu0 %v3224_v0  ;;  %v3316_v35 = vpack.c.bf16 %v363_v33, %v360_v32  ;;  %v385_v41 = vld [vmem:[#allocation4 + $0xd8] sm:$0xff]  ;;  %v392_v44 = vld [vmem:[#allocation4 + $0x110] sm:$0xff]  ;;  %v375_v47 = vld [vmem:[#allocation4 + $0x88] sm:$0xff] }
  0x1e   :  { %2614 = vmatprep.subr.bf16.mxu0 %v3296_v19  ;;  %2314 = vmatmul.mubr.msk.f32.vlgmr.msra.gmra.mrb[0].mxu1 %vm70_vm1, %v41_v17  ;;  %v369_v42 = vld [vmem:[#allocation4 + $0x58] sm:$0xff]  ;;  %v372_v46 = vld [vmem:[#allocation4 + $0x70] sm:$0xff]  ;;  %v44_v48 = vld [vmem:[%s3785_s0 + $0x20] sm:$0xff]  ;;  %v3340_v49 = vpack.c.bf16 %v385_v41, %v382_v40  ;;  %v53_v30 = vshrl.u32 %v52_v29, 7 }
  0x1f   :  { %v389_v43 = vld [vmem:[#allocation4 + $0xf8] sm:$0xff]  ;;  %2639 = vmatpush3.bf16.msra.mxu1 %v3316_v35  ;;  %v3330_v45 = vpack.c.bf16 %v369_v42, %v366_v38  ;;  %2316 = vmatprep.mubr.msk.f32.mxu1 %vm70_vm1, %v42_v24  ;;  %v388_v51 = vld [vmem:[#allocation4 + $0xf0] sm:$0xff]  ;;  %v391_v52 = vld [vmem:[#allocation4 + $0x108] sm:$0xff]  ;;  %v3347_v55 = vpack.c.bf16 %v375_v47, %v372_v46 }
  0x20   :  { %2134 = vmatmul.mubr.msk.f32.gmra.mrb[4].mxu0 %vm70_vm1, %v42_v24  ;;  %2640 = vmatprep.subr.bf16.mxu1 %v3225_v34  ;;  %v3343_v50 = vpack.c.bf16 %v392_v44, %v389_v43  ;;  %v395_v53 = vld [vmem:[#allocation4 + $0x128] sm:$0xff]  ;;  %v398_v54 = vld [vmem:[#allocation4 + $0x140] sm:$0xff]  ;;  %v381_v57 = vld [vmem:[#allocation4 + $0xb8] sm:$0xff]  ;;  %v3357_v59 = vpack.c.bf16 %v391_v52, %v388_v51  ;;  %v62_v31 = vsub.s32 2, %v53_v30 }
  0x21   :  { %2616 = vmatpush1.bf16.msra.mxu0 %v3304_v25  ;;  %184 = vmatprep.mubr.f32.mxu0 %v3224_v0  ;;  %v378_v56 = vld [vmem:[#allocation4 + $0xa0] sm:$0xff]  ;;  %v45_v58 = vld [vmem:[%s3785_s0 + $0x28] sm:$0xff]  ;;  %v46_v60 = vld [vmem:[%s3785_s0 + $0x30] sm:$0xff]  ;;  %v3363_v61 = vpack.c.bf16 %v398_v54, %v395_v53 }
  0x22   :  { %2618 = vmatprep.subr.bf16.mxu0 %v3310_v27  ;;  %2317 = vmatmul.mubr.msk.f32.gmra.mrb[2].mxu1 %vm70_vm1, %v43_v36  ;;  %v394_v62 = vld [vmem:[#allocation4 + $0x120] sm:$0xff]  ;;  %v397_v63 = vld [vmem:[#allocation4 + $0x138] sm:$0xff]  ;;  %v404_v2 = vld [vmem:[#allocation4 + $0x170] sm:$0xff]  ;;  %v3367_v3 = vpack.c.bf16 %v381_v57, %v378_v56  ;;  %v54_v57 = vsub.s32 0, %v53_v30 }
  0x23   :  { %2642 = vmatpush3.bf16.msra.mxu1 %v3330_v45  ;;  %2319 = vmatprep.mubr.msk.f32.mxu1 %vm70_vm1, %v44_v48  ;;  %v401_v1 = vld [vmem:[#allocation4 + $0x158] sm:$0xff]  ;;  %v384_v4 = vld [vmem:[#allocation4 + $0xd0] sm:$0xff]  ;;  %v387_v5 = vld [vmem:[#allocation4 + $0xe8] sm:$0xff]  ;;  %v3374_v6 = vpack.c.bf16 %v397_v63, %v394_v62 }
  0x24   :  { %2135 = vmatmul.mubr.msk.f32.gmra.mrb[6].mxu0 %vm70_vm1, %v43_v36  ;;  %2643 = vmatprep.subr.bf16.mxu1 %v3225_v34  ;;  %v47_v7 = vld [vmem:[%s3785_s0 + $0x38] sm:$0xff]  ;;  %v3380_v10 = vpack.c.bf16 %v404_v2, %v401_v1  ;;  %v400_v11 = vld [vmem:[#allocation4 + $0x150] sm:$0xff]  ;;  %v403_v13 = vld [vmem:[#allocation4 + $0x168] sm:$0xff]  ;;  %v3384_v14 = vpack.c.bf16 %v387_v5, %v384_v4 }
  0x25   :  { %2620 = vmatpush1.bf16.msra.mxu0 %v3323_v37  ;;  %190 = vmatprep.mubr.f32.mxu0 %v3224_v0  ;;  %v390_v15 = vld [vmem:[#allocation4 + $0x100] sm:$0xff]  ;;  %v393_v16 = vld [vmem:[#allocation4 + $0x118] sm:$0xff]  ;;  %v3392_v17 = vpack.c.bf16 %v403_v13, %v400_v11  ;;  %v396_v21 = vld [vmem:[#allocation4 + $0x130] sm:$0xff] }
  0x26   :  { %2622 = vmatprep.subr.bf16.mxu0 %v3326_v39  ;;  %2320 = vmatmul.mubr.msk.f32.gmra.mrb[4].mxu1 %vm70_vm1, %v45_v58  ;;  %v3396_v20 = vpack.c.bf16 %v393_v16, %v390_v15  ;;  %v399_v22 = vld [vmem:[#allocation4 + $0x148] sm:$0xff]  ;;  %v402_v24 = vld [vmem:[#allocation4 + $0x160] sm:$0xff]  ;;  %v405_v26 = vld [vmem:[#allocation4 + $0x178] sm:$0xff] }
  0x27   :  { %2645 = vmatpush3.bf16.msra.mxu1 %v3347_v55  ;;  %2322 = vmatprep.mubr.msk.f32.mxu1 %vm70_vm1, %v46_v60  ;;  %v3404_v23 = vpack.c.bf16 %v399_v22, %v396_v21  ;;  %v3412_v28 = vpack.c.bf16 %v405_v26, %v402_v24  ;;  %v50_v32 = vld [vmem:[%s3788_s3] sm:$0x7] }
  0x28   :  { %2136 = vmatmul.mubr.msk.f32.gmra.mrb[8].mxu0 %vm70_vm1, %v44_v48  ;;  %2646 = vmatprep.subr.bf16.mxu1 %v3225_v34  ;;  %v63_v33 = vrot.slane %v50_v32, %v62_v31  ;;  %v3476_v22 = vld [vmem:[%s3789_s4] ss:$0 sm:$0xff]  ;;  %s3227_s4 = smov [#allocation7]  }
  0x29   :  { %2624 = vmatpush1.bf16.msra.mxu0 %v3340_v49  ;;  %196 = vmatprep.mubr.f32.mxu0 %v3224_v0  ;;  %s2114_s27 = sshll.u32 %s3227_s4, 4  ;;  %s2115_s27 = int_to_ptr.vmem [resolvable:$true] %s2114_s27 }
  0x2a   :  { %2626 = vmatprep.subr.bf16.mxu0 %v3343_v50  ;;  %2323 = vmatmul.mubr.msk.f32.gmra.mrb[6].mxu1 %vm70_vm1, %v47_v7  ;;  %s3195_s28 = scalar_lea.vmem %s2115_s27, 128  ;;  %p3200_p9 = scmp.lt.s32.totalorder %s2115_s27, %s2115_s27 }
  0x2b   :  { %2648 = vmatpush3.bf16.msra.mxu1 %v3367_v3  ;;  %2357 = vmatprep.mubr.msk.f32.mxu1 %vm3226_vm2, %v3224_v0  ;;  %p3196_p8 = scmp.ne.s32.totalorder %s2115_s27, %s3195_s28  ;;  %p3201_p10 = scmp.lt.s32.totalorder %s3195_s28, %s3195_s28 }
  0x2c   :  { %2137 = vmatmul.mubr.msk.f32.gmra.mrb[10].mxu0 %vm70_vm1, %v45_v58  ;;  %2649 = vmatprep.subr.bf16.mxu1 %v3225_v34  ;;  %v58_v58 = vsub.s32 1, %v53_v30 }
  0x2d   :  { %2628 = vmatpush1.bf16.msra.mxu0 %v3357_v59  ;;  %202 = vmatprep.mubr.f32.mxu0 %v3224_v0  ;;  %p3202_p11 = por %p3201_p10, %p3200_p9 }
  0x2e   :  { %2630 = vmatprep.subr.bf16.mxu0 %v3363_v61  ;;  %v3469_v63 = vrot.slane %v50_v32, %v58_v58 }
  0x2f   :  { %2651 = vmatpush3.bf16.msra.mxu1 %v3384_v14  ;;  %p3203_p12 = pnand %p3202_p11, %p3196_p8 }
  0x30   :  { %2138 = vmatmul.mubr.msk.f32.gmra.mrb[12].mxu0 %vm70_vm1, %v46_v60  ;;  %2652 = vmatprep.subr.bf16.mxu1 %v3225_v34  ;;  %v3467_v60 = vrot.slane %v50_v32, %v54_v57 }
  0x31   :  { %2632 = vmatpush1.bf16.msra.mxu0 %v3374_v6  ;;  %208 = vmatprep.mubr.f32.mxu0 %v3224_v0 }
  0x32   :  { %2634 = vmatprep.subr.bf16.mxu0 %v3380_v10 }
  0x33   :  { %2654 = vmatpush3.bf16.msra.mxu1 %v3396_v20 }
  0x34   :  { %2139 = vmatmul.mubr.msk.f32.gmra.mrb[14].mxu0 %vm70_vm1, %v47_v7  ;;  %2655 = vmatprep.subr.bf16.mxu1 %v3225_v34 }
  0x35   :  { %2636 = vmatpush1.bf16.msra.mxu0 %v3392_v17  ;;  %470 = vmatprep.mubr.f32.mxu0 %v3224_v0 }
  0x36   :  { %2662 = vmatprep.subr.bf16.mxu0 %v3278_v8 }
  0x37   :  { %2657 = vmatpush3.bf16.msra.mxu1 %v3404_v23 }
  0x38   :  { %471 = vmatmul.mubr.f32.vlgmr.msra.gmra.mrb[0].mxu0 %v3224_v0  ;;  %2658 = vmatprep.subr.bf16.mxu1 %v3225_v34 }
  0x39   :  { %2664 = vmatpush1.bf16.msra.mxu0 %v3280_v9  ;;  %689 = vmatprep.mubr.f32.mxu0 %v3224_v0 }
  0x3a   :  { %2666 = vmatprep.subr.bf16.mxu0 %v3283_v12 }
  0x3b   :  { %2660 = vmatpush3.bf16.msra.mxu1 %v3412_v28 }
  0x3c   :  { %2693 = vmatprep.subr.bf16.mxu1 %v3225_v34 }
  0x3d   :  { %2668 = vmatpush1.bf16.msra.mxu0 %v3293_v18 }
  0x3e   :  { %2670 = vmatprep.subr.bf16.mxu0 %v3296_v19  ;;  %2358 = vmatmul.mubr.f32.vlgmr.msra.gmra.mrb[8].mxu1 %v3224_v0 }
  0x3f   :  { %2695 = vmatpush3.bf16.msra.mxu1 %v3316_v35  ;;  %2392 = vmatprep.mubr.msk.f32.mxu1 %vm3226_vm2, %v3224_v0 }
  0x40   :  { %2696 = vmatprep.subr.bf16.mxu1 %v3225_v34 }
  0x41   :  { %2672 = vmatpush1.bf16.msra.mxu0 %v3304_v25 }
  0x42   :  { %2674 = vmatprep.subr.bf16.mxu0 %v3310_v27 }
  0x43   :  { %2698 = vmatpush3.bf16.msra.mxu1 %v3330_v45 }
  0x44   :  { %2699 = vmatprep.subr.bf16.mxu1 %v3225_v34 }
  0x45   :  { %2676 = vmatpush1.bf16.msra.mxu0 %v3323_v37 }
  0x46   :  { %2678 = vmatprep.subr.bf16.mxu0 %v3326_v39 }
  0x47   :  { %2701 = vmatpush3.bf16.msra.mxu1 %v3347_v55 }
  0x48   :  { %2702 = vmatprep.subr.bf16.mxu1 %v3225_v34 }
  0x49   :  { %2680 = vmatpush1.bf16.msra.mxu0 %v3340_v49 }
  0x4a   :  { %2682 = vmatprep.subr.bf16.mxu0 %v3343_v50 }
  0x4b   :  { %2704 = vmatpush3.bf16.msra.mxu1 %v3367_v3 }
  0x4c   :  { %2705 = vmatprep.subr.bf16.mxu1 %v3225_v34 }
  0x4d   :  { %2684 = vmatpush1.bf16.msra.mxu0 %v3357_v59 }
  0x4e   :  { %2686 = vmatprep.subr.bf16.mxu0 %v3363_v61 }
  0x4f   :  { %2707 = vmatpush3.bf16.msra.mxu1 %v3384_v14 }
  0x50   :  { %2708 = vmatprep.subr.bf16.mxu1 %v3225_v34 }
  0x51   :  { %2688 = vmatpush1.bf16.msra.mxu0 %v3374_v6 }
  0x52   :  { %2690 = vmatprep.subr.bf16.mxu0 %v3380_v10 }
  0x53   :  { %2710 = vmatpush3.bf16.msra.mxu1 %v3396_v20 }
  0x54   :  { %2711 = vmatprep.subr.bf16.mxu1 %v3225_v34 }
  0x55   :  { %2692 = vmatpush1.bf16.msra.mxu0 %v3392_v17 }
  0x56   :  { %2718 = vmatprep.subr.bf16.mxu0 %v3278_v8 }
  0x57   :  { %2713 = vmatpush3.bf16.msra.mxu1 %v3404_v23 }
  0x58   :  { %2714 = vmatprep.subr.bf16.mxu1 %v3225_v34 }
  0x5b   :  { %2716 = vmatpush3.bf16.msra.mxu1 %v3412_v28 }
  0x5c   :  { %2749 = vmatprep.subr.bf16.mxu1 %v3225_v34 }
  0xf1   :  { %v2315_v36 = vpop.f32.mrb[0].mxu1 }
  0xf2   :  { %v3453_v38 = vadd.f32 %v2315_v36, %v63_v33  ;;  %v281_v40 = vpop.f32.mrb[1].mxu1 }
  0xf3   :  { %v282_v30 = vadd.f32 %v281_v40, %v63_v33 }
  0xf5   :  { %v2318_v41 = vpop.f32.mrb[2].mxu1 }
  0xf6   :  { %v3455_v42 = vadd.f32 %v2318_v41, %v63_v33  ;;  %v291_v43 = vpop.f32.mrb[3].mxu1 }
  0xf7   :  { %v3457_v44 = vadd.f32 %v291_v43, %v63_v33 }
  0xf9   :  { %v2321_v46 = vpop.f32.mrb[4].mxu1 }
  0xfa   :  { %v3459_v47 = vadd.f32 %v2321_v46, %v63_v33  ;;  %v301_v48 = vpop.f32.mrb[5].mxu1 }
  0xfb   :  { %v3461_v51 = vadd.f32 %v301_v48, %v63_v33 }
  0xfd   :  { %v2324_v52 = vpop.f32.mrb[6].mxu1 }
  0xfe   :  { %v3463_v53 = vadd.f32 %v2324_v52, %v63_v33  ;;  %v311_v54 = vpop.f32.mrb[7].mxu1 }
  0xff   :  { %v3465_v56 = vadd.f32 %v311_v54, %v63_v33 }
 0x10b   :  { %v472_v62 = vpop.f32.mrb[0].mxu0 }
 0x10c   :  { %v3053_v1 = vadd.f32 %v472_v62, %v3467_v60  ;;  %v474_v2 = vpop.f32.mrb[1].mxu0 }
 0x10d   :  { %v3054_v5 = vadd.f32 %v474_v2, %v3469_v63 }
 0x10e   :  { %v2150_v4 = vmul.f32 -1.442695, %v3053_v1 }
 0x10f   :  { %v2151_v7 = vmul.f32 -1.442695, %v3054_v5 }
 0x110   :  { %3093 = vpow2.f32 %v2150_v4 }
 0x111   :  { %v543_v11 = vpop.f32.mrb[8].mxu1  ;;  %3095 = vpow2.f32 %v2151_v7 }
 0x112   :  { %v2359_v13 = vpop.f32.mrb[9].mxu1  ;;  %v561_v26 = vadd.f32 %v3476_v22, %v543_v11 }
 0x11a   :  { %v3094_v15 = vpop.eup %3093 }
 0x11b   :  { %v551_v16 = vadd.f32 1.0, %v3094_v15  ;;  %v3096_v21 = vpop.eup %3095 }
 0x11c   :  { %v558_v24 = vadd.f32 1.0, %v3096_v21 }
 0x11d   :  { %3097 = vrcp.f32 %v551_v16 }
 0x11e   :  { %3099 = vrcp.f32 %v558_v24 }
 0x127   :  { %v3098_v29 = vpop.eup %3097 }
 0x128   :  { %v562_v31 = vmul.f32 %v3098_v29, %v561_v26  ;;  %v3100_v36 = vpop.eup %3099 }
 0x129   :  { %v565_v41 = vsub.f32 1.0, %v3100_v36  ;;  %v567_v48 = vmul.f32 0.0, %v3100_v36  ;;  %v1238_v36 = vld [vmem:[#allocation4 + $0x20] sm:$0xff] }
 0x12a   :  { %v563_v32 = vadd.f32 %v562_v31, %v282_v30 }
 0x12c   :  { %3101 = vtanh.f32 %v563_v32 }
 0x136   :  { %v3102_v43 = vpop.eup %3101 }
 0x137   :  { %v566_v46 = vmul.f32 %v3102_v43, %v565_v41  ;;  %v1237_v43 = vld [vmem:[#allocation4 + $0x18] sm:$0xff] }
 0x139   :  { %v568_v52 = vadd.f32 %v567_v48, %v566_v46  ;;  %v1241_v48 = vld [vmem:[#allocation4 + $0x38] sm:$0xff] }
 0x13b   :  { %690 = vmatmul.mubr.f32.vlgmr.msra.gmra.mrb[2].mxu0 %v568_v52  ;;  %2393 = vmatmul.mubr.f32.vlgmr.msra.gmra.mrb[10].mxu1 %v568_v52 }
 0x13c   :  { %2720 = vmatpush1.bf16.msra.mxu0 %v3280_v9  ;;  %2751 = vmatpush3.bf16.msra.mxu1 %v3316_v35 }
 0x13d   :  { %2722 = vmatprep.subr.bf16.mxu0 %v3283_v12  ;;  %2752 = vmatprep.subr.bf16.mxu1 %v3225_v34 }
 0x13e   :  { %908 = vmatprep.mubr.f32.mxu0 %v3224_v0  ;;  %2427 = vmatprep.mubr.msk.f32.mxu1 %vm3226_vm2, %v3224_v0 }
 0x140   :  { %2724 = vmatpush1.bf16.msra.mxu0 %v3293_v18  ;;  %2754 = vmatpush3.bf16.msra.mxu1 %v3330_v45 }
 0x141   :  { %2726 = vmatprep.subr.bf16.mxu0 %v3296_v19  ;;  %2755 = vmatprep.subr.bf16.mxu1 %v3225_v34 }
 0x144   :  { %2728 = vmatpush1.bf16.msra.mxu0 %v3304_v25  ;;  %2757 = vmatpush3.bf16.msra.mxu1 %v3347_v55 }
 0x145   :  { %2730 = vmatprep.subr.bf16.mxu0 %v3310_v27  ;;  %2758 = vmatprep.subr.bf16.mxu1 %v3225_v34 }
 0x148   :  { %2732 = vmatpush1.bf16.msra.mxu0 %v3323_v37  ;;  %2760 = vmatpush3.bf16.msra.mxu1 %v3367_v3 }
 0x149   :  { %2734 = vmatprep.subr.bf16.mxu0 %v3326_v39  ;;  %2761 = vmatprep.subr.bf16.mxu1 %v3225_v34 }
 0x14c   :  { %2736 = vmatpush1.bf16.msra.mxu0 %v3340_v49  ;;  %2763 = vmatpush3.bf16.msra.mxu1 %v3384_v14 }
 0x14d   :  { %2738 = vmatprep.subr.bf16.mxu0 %v3343_v50  ;;  %2764 = vmatprep.subr.bf16.mxu1 %v3225_v34 }
 0x150   :  { %2740 = vmatpush1.bf16.msra.mxu0 %v3357_v59  ;;  %2766 = vmatpush3.bf16.msra.mxu1 %v3396_v20 }
 0x151   :  { %2742 = vmatprep.subr.bf16.mxu0 %v3363_v61  ;;  %2767 = vmatprep.subr.bf16.mxu1 %v3225_v34 }
 0x154   :  { %2744 = vmatpush1.bf16.msra.mxu0 %v3374_v6  ;;  %2769 = vmatpush3.bf16.msra.mxu1 %v3404_v23 }
 0x155   :  { %2746 = vmatprep.subr.bf16.mxu0 %v3380_v10  ;;  %2770 = vmatprep.subr.bf16.mxu1 %v3225_v34 }
 0x158   :  { %2748 = vmatpush1.bf16.msra.mxu0 %v3392_v17  ;;  %2772 = vmatpush3.bf16.msra.mxu1 %v3412_v28 }
 0x159   :  { %2774 = vmatprep.subr.bf16.mxu0 %v3278_v8  ;;  %2805 = vmatprep.subr.bf16.mxu1 %v3225_v34 }
 0x20e   :  { %v691_v33 = vpop.f32.mrb[2].mxu0  ;;  %v762_v40 = vpop.f32.mrb[10].mxu1 }
 0x20f   :  { %v3055_v54 = vadd.f32 %v691_v33, %v3467_v60  ;;  %v693_v57 = vpop.f32.mrb[3].mxu0  ;;  %v2394_v58 = vpop.f32.mrb[11].mxu1  ;;  %v780_v8 = vadd.f32 %v3476_v22, %v762_v40  ;;  %v1240_v33 = vld [vmem:[#allocation4 + $0x30] sm:$0xff] }
 0x210   :  { %v3056_v1 = vadd.f32 %v693_v57, %v3469_v63  ;;  %v1250_v57 = vld [vmem:[#allocation4 + $0x80] sm:$0xff] }
 0x211   :  { %v2152_v62 = vmul.f32 -1.442695, %v3055_v54  ;;  %v1247_v54 = vld [vmem:[#allocation4 + $0x68] sm:$0xff] }
 0x212   :  { %v2153_v2 = vmul.f32 -1.442695, %v3056_v1  ;;  %v3581_v58 = vpack.c.bf16 %v1250_v57, %v1247_v54  ;;  %v1249_v1 = vld [vmem:[#allocation4 + $0x78] sm:$0xff] }
 0x213   :  { %3103 = vpow2.f32 %v2152_v62  ;;  %v1246_v62 = vld [vmem:[#allocation4 + $0x60] sm:$0xff] }
 0x214   :  { %3105 = vpow2.f32 %v2153_v2  ;;  %v3583_v2 = vpack.c.bf16 %v1249_v1, %v1246_v62 }
 0x21d   :  { %v3104_v4 = vpop.eup %3103 }
 0x21e   :  { %v770_v5 = vadd.f32 1.0, %v3104_v4  ;;  %v3106_v7 = vpop.eup %3105  ;;  %v1253_v4 = vld [vmem:[#allocation4 + $0x98] sm:$0xff] }
 0x21f   :  { %v777_v11 = vadd.f32 1.0, %v3106_v7 }
 0x220   :  { %3107 = vrcp.f32 %v770_v5  ;;  %v1256_v5 = vld [vmem:[#allocation4 + $0xb0] sm:$0xff] }
 0x221   :  { %3109 = vrcp.f32 %v777_v11  ;;  %v3587_v7 = vpack.c.bf16 %v1256_v5, %v1253_v4  ;;  %v1252_v11 = vld [vmem:[#allocation4 + $0x90] sm:$0xff] }
 0x22a   :  { %v3108_v13 = vpop.eup %3107 }
 0x22b   :  { %v781_v15 = vmul.f32 %v3108_v13, %v780_v8  ;;  %v3110_v21 = vpop.eup %3109  ;;  %v1255_v8 = vld [vmem:[#allocation4 + $0xa8] sm:$0xff]  ;;  %v1254_v13 = vld [vmem:[#allocation4 + $0xa0] sm:$0xff] }
 0x22c   :  { %v784_v24 = vsub.f32 1.0, %v3110_v21  ;;  %v786_v30 = vmul.f32 %v3110_v21, %v568_v52 }
 0x22d   :  { %v782_v16 = vadd.f32 %v781_v15, %v3453_v38  ;;  %v3589_v15 = vpack.c.bf16 %v1255_v8, %v1252_v11 }
 0x22f   :  { %3111 = vtanh.f32 %v782_v16  ;;  %v1257_v16 = vld [vmem:[#allocation4 + $0xb8] sm:$0xff] }
 0x230   :  { %v3592_v21 = vpack.c.bf16 %v1257_v16, %v1254_v13 }
 0x239   :  { %v3112_v26 = vpop.eup %3111 }
 0x23a   :  { %v785_v29 = vmul.f32 %v3112_v26, %v784_v24  ;;  %v1259_v24 = vld [vmem:[#allocation4 + $0xc8] sm:$0xff]  ;;  %v1262_v26 = vld [vmem:[#allocation4 + $0xe0] sm:$0xff] }
 0x23c   :  { %v787_v31 = vadd.f32 %v786_v30, %v785_v29  ;;  %v3596_v29 = vpack.c.bf16 %v1262_v26, %v1259_v24  ;;  %v1258_v30 = vld [vmem:[#allocation4 + $0xc0] sm:$0xff] }
 0x23e   :  { %909 = vmatmul.mubr.f32.vlgmr.msra.gmra.mrb[4].mxu0 %v787_v31  ;;  %2428 = vmatmul.mubr.f32.vlgmr.msra.gmra.mrb[12].mxu1 %v787_v31 }
 0x23f   :  { %2776 = vmatpush1.bf16.msra.mxu0 %v3280_v9  ;;  %2807 = vmatpush3.bf16.msra.mxu1 %v3316_v35 }
 0x240   :  { %2778 = vmatprep.subr.bf16.mxu0 %v3283_v12  ;;  %2808 = vmatprep.subr.bf16.mxu1 %v3225_v34 }
 0x241   :  { %1127 = vmatprep.mubr.f32.mxu0 %v3224_v0  ;;  %2462 = vmatprep.mubr.msk.f32.mxu1 %vm3226_vm2, %v3224_v0 }
 0x243   :  { %2780 = vmatpush1.bf16.msra.mxu0 %v3293_v18  ;;  %2810 = vmatpush3.bf16.msra.mxu1 %v3330_v45 }
 0x244   :  { %2782 = vmatprep.subr.bf16.mxu0 %v3296_v19  ;;  %2811 = vmatprep.subr.bf16.mxu1 %v3225_v34 }
 0x247   :  { %2784 = vmatpush1.bf16.msra.mxu0 %v3304_v25  ;;  %2813 = vmatpush3.bf16.msra.mxu1 %v3347_v55 }
 0x248   :  { %2786 = vmatprep.subr.bf16.mxu0 %v3310_v27  ;;  %2814 = vmatprep.subr.bf16.mxu1 %v3225_v34 }
 0x24b   :  { %2788 = vmatpush1.bf16.msra.mxu0 %v3323_v37  ;;  %2816 = vmatpush3.bf16.msra.mxu1 %v3367_v3 }
 0x24c   :  { %2790 = vmatprep.subr.bf16.mxu0 %v3326_v39  ;;  %2817 = vmatprep.subr.bf16.mxu1 %v3225_v34 }
 0x24f   :  { %2792 = vmatpush1.bf16.msra.mxu0 %v3340_v49  ;;  %2819 = vmatpush3.bf16.msra.mxu1 %v3384_v14 }
 0x250   :  { %2794 = vmatprep.subr.bf16.mxu0 %v3343_v50  ;;  %2820 = vmatprep.subr.bf16.mxu1 %v3225_v34 }
 0x253   :  { %2796 = vmatpush1.bf16.msra.mxu0 %v3357_v59  ;;  %2822 = vmatpush3.bf16.msra.mxu1 %v3396_v20 }
 0x254   :  { %2798 = vmatprep.subr.bf16.mxu0 %v3363_v61  ;;  %2823 = vmatprep.subr.bf16.mxu1 %v3225_v34 }
 0x257   :  { %2800 = vmatpush1.bf16.msra.mxu0 %v3374_v6  ;;  %2825 = vmatpush3.bf16.msra.mxu1 %v3404_v23 }
 0x258   :  { %2802 = vmatprep.subr.bf16.mxu0 %v3380_v10  ;;  %2826 = vmatprep.subr.bf16.mxu1 %v3225_v34 }
 0x25b   :  { %2804 = vmatpush1.bf16.msra.mxu0 %v3392_v17  ;;  %2828 = vmatpush3.bf16.msra.mxu1 %v3412_v28 }
 0x25c   :  { %2861 = vmatprep.subr.bf16.mxu1 %v3225_v34 }
 0x311   :  { %v910_v9 = vpop.f32.mrb[4].mxu0  ;;  %v981_v12 = vpop.f32.mrb[12].mxu1 }
 0x312   :  { %v3057_v18 = vadd.f32 %v910_v9, %v3467_v60  ;;  %v912_v19 = vpop.f32.mrb[5].mxu0  ;;  %v2429_v25 = vpop.f32.mrb[13].mxu1  ;;  %v999_v3 = vadd.f32 %v3476_v22, %v981_v12  ;;  %v1260_v9 = vld [vmem:[#allocation4 + $0xd0] sm:$0xff] }
 0x313   :  { %v3058_v37 = vadd.f32 %v912_v19, %v3469_v63  ;;  %v1265_v25 = vld [vmem:[#allocation4 + $0xf8] sm:$0xff] }
 0x314   :  { %v2154_v27 = vmul.f32 -1.442695, %v3057_v18  ;;  %v1263_v18 = vld [vmem:[#allocation4 + $0xe8] sm:$0xff] }
 0x315   :  { %v2155_v39 = vmul.f32 -1.442695, %v3058_v37  ;;  %v3602_v19 = vpack.c.bf16 %v1263_v18, %v1260_v9  ;;  %v1264_v37 = vld [vmem:[#allocation4 + $0xf0] sm:$0xff] }
 0x316   :  { %3113 = vpow2.f32 %v2154_v27  ;;  %v1268_v27 = vld [vmem:[#allocation4 + $0x110] sm:$0xff] }
 0x317   :  { %3115 = vpow2.f32 %v2155_v39  ;;  %v3606_v39 = vpack.c.bf16 %v1268_v27, %v1265_v25 }
 0x320   :  { %v3114_v49 = vpop.eup %3113 }
 0x321   :  { %v989_v50 = vadd.f32 1.0, %v3114_v49  ;;  %v3116_v59 = vpop.eup %3115  ;;  %v1267_v49 = vld [vmem:[#allocation4 + $0x108] sm:$0xff] }
 0x322   :  { %v996_v61 = vadd.f32 1.0, %v3116_v59  ;;  %v1269_v59 = vld [vmem:[#allocation4 + $0x118] sm:$0xff] }
 0x323   :  { %3117 = vrcp.f32 %v989_v50  ;;  %v1266_v50 = vld [vmem:[#allocation4 + $0x100] sm:$0xff] }
 0x324   :  { %3119 = vrcp.f32 %v996_v61  ;;  %v3609_v61 = vpack.c.bf16 %v1267_v49, %v1264_v37 }
 0x32d   :  { %v3118_v6 = vpop.eup %3117 }
 0x32e   :  { %v1000_v10 = vmul.f32 %v3118_v6, %v999_v3  ;;  %v3120_v17 = vpop.eup %3119  ;;  %v3611_v3 = vpack.c.bf16 %v1269_v59, %v1266_v50  ;;  %v1271_v6 = vld [vmem:[#allocation4 + $0x128] sm:$0xff] }
 0x32f   :  { %v1003_v20 = vsub.f32 1.0, %v3120_v17  ;;  %v1005_v38 = vmul.f32 %v3120_v17, %v787_v31  ;;  %v1261_v31 = vld [vmem:[#allocation4 + $0xd8] sm:$0xff] }
 0x330   :  { %v1001_v14 = vadd.f32 %v1000_v10, %v3457_v44  ;;  %v1235_v44 = vld [vmem:[#allocation4 + $0x8] sm:$0xff]  ;;  %v3599_v12 = vpack.c.bf16 %v1261_v31, %v1258_v30  ;;  %v1274_v10 = vld [vmem:[#allocation4 + $0x140] sm:$0xff] }
 0x331   :  { %v3569_v41 = vpack.c.bf16 %v1238_v36, %v1235_v44  ;;  %v3614_v17 = vpack.c.bf16 %v1274_v10, %v1271_v6  ;;  %v1277_v44 = vld [vmem:[#allocation4 + $0x158] sm:$0xff]  ;;  %v1280_v36 = vld [vmem:[#allocation4 + $0x170] sm:$0xff] }
 0x332   :  { %3121 = vtanh.f32 %v1001_v14  ;;  %v1270_v14 = vld [vmem:[#allocation4 + $0x120] sm:$0xff] }
 0x333   :  { %2830 = vmatprep.subr.bf16.mxu0 %v3569_v41 }
 0x33c   :  { %v3122_v23 = vpop.eup %3121 }
 0x33d   :  { %v1004_v28 = vmul.f32 %v3122_v23, %v1003_v20  ;;  %v1273_v20 = vld [vmem:[#allocation4 + $0x138] sm:$0xff]  ;;  %v1272_v23 = vld [vmem:[#allocation4 + $0x130] sm:$0xff] }
 0x33f   :  { %v3556_v32 = vadd.f32 %v1005_v38, %v1004_v28  ;;  %v1275_v28 = vld [vmem:[#allocation4 + $0x148] sm:$0xff]  ;;  %v3617_v38 = vpack.c.bf16 %v1273_v20, %v1270_v14  ;;  %v1461_v20 = vld [vmem:[#allocation4 + $0x40] sm:$0xff] }
 0x341   :  { %1128 = vmatmul.mubr.f32.vlgmr.msra.gmra.mrb[6].mxu0 %v3556_v32  ;;  %2463 = vmatmul.mubr.f32.vlgmr.msra.gmra.mrb[14].mxu1 %v3556_v32 }
 0x342   :  { %2863 = vmatpush3.bf16.msra.mxu1 %v3316_v35  ;;  %1346 = vmatprep.mubr.f32.mxu0 %v3224_v0  ;;  %v1234_v35 = vld [vmem:[#allocation4] sm:$0xff] }
 0x343   :  { %2864 = vmatprep.subr.bf16.mxu1 %v3225_v34  ;;  %2497 = vmatprep.mubr.msk.f32.mxu1 %vm3226_vm2, %v3224_v0  ;;  %v3571_v46 = vpack.c.bf16 %v1237_v43, %v1234_v35  ;;  %v3621_v35 = vpack.c.bf16 %v1275_v28, %v1272_v23  ;;  %v3623_v43 = vpack.c.bf16 %v1280_v36, %v1277_v44  ;;  %v1464_v23 = vld [vmem:[#allocation4 + $0x58] sm:$0xff]  ;;  %v1467_v44 = vld [vmem:[#allocation4 + $0x70] sm:$0xff]  ;;  %v1470_v36 = vld [vmem:[#allocation4 + $0x88] sm:$0xff] }
 0x344   :  { %v3670_v28 = vpack.c.bf16 %v1464_v23, %v1461_v20 }
 0x345   :  { %2832 = vmatpush1.bf16.msra.mxu0 %v3571_v46 }
 0x346   :  { %2866 = vmatpush3.bf16.msra.mxu1 %v3330_v45  ;;  %v1244_v45 = vld [vmem:[#allocation4 + $0x50] sm:$0xff] }
 0x347   :  { %2867 = vmatprep.subr.bf16.mxu1 %v3225_v34  ;;  %v3575_v52 = vpack.c.bf16 %v1244_v45, %v1241_v48  ;;  %v1276_v48 = vld [vmem:[#allocation4 + $0x150] sm:$0xff]  ;;  %v1279_v45 = vld [vmem:[#allocation4 + $0x168] sm:$0xff] }
 0x348   :  { %v3627_v54 = vpack.c.bf16 %v1279_v45, %v1276_v48  ;;  %v3674_v48 = vpack.c.bf16 %v1470_v36, %v1467_v44 }
 0x349   :  { %2834 = vmatprep.subr.bf16.mxu0 %v3575_v52 }
 0x34a   :  { %2869 = vmatpush3.bf16.msra.mxu1 %v3347_v55  ;;  %v1243_v55 = vld [vmem:[#allocation4 + $0x48] sm:$0xff] }
 0x34b   :  { %2870 = vmatprep.subr.bf16.mxu1 %v3225_v34  ;;  %v3577_v40 = vpack.c.bf16 %v1243_v55, %v1240_v33  ;;  %v1278_v33 = vld [vmem:[#allocation4 + $0x160] sm:$0xff]  ;;  %v1281_v55 = vld [vmem:[#allocation4 + $0x178] sm:$0xff] }
 0x34c   :  { %v3631_v57 = vpack.c.bf16 %v1281_v55, %v1278_v33 }
 0x34d   :  { %2836 = vmatpush1.bf16.msra.mxu0 %v3577_v40 }
 0x34e   :  { %2838 = vmatprep.subr.bf16.mxu0 %v3581_v58  ;;  %2872 = vmatpush3.bf16.msra.mxu1 %v3592_v21 }
 0x34f   :  { %2873 = vmatprep.subr.bf16.mxu1 %v3225_v34 }
 0x351   :  { %2840 = vmatpush1.bf16.msra.mxu0 %v3583_v2 }
 0x352   :  { %2842 = vmatprep.subr.bf16.mxu0 %v3587_v7  ;;  %2875 = vmatpush3.bf16.msra.mxu1 %v3602_v19 }
 0x353   :  { %2876 = vmatprep.subr.bf16.mxu1 %v3225_v34 }
 0x355   :  { %2844 = vmatpush1.bf16.msra.mxu0 %v3589_v15 }
 0x356   :  { %2846 = vmatprep.subr.bf16.mxu0 %v3596_v29  ;;  %2878 = vmatpush3.bf16.msra.mxu1 %v3611_v3 }
 0x357   :  { %2879 = vmatprep.subr.bf16.mxu1 %v3225_v34 }
 0x359   :  { %2848 = vmatpush1.bf16.msra.mxu0 %v3599_v12 }
 0x35a   :  { %2850 = vmatprep.subr.bf16.mxu0 %v3606_v39  ;;  %2881 = vmatpush3.bf16.msra.mxu1 %v3621_v35 }
 0x35b   :  { %2882 = vmatprep.subr.bf16.mxu1 %v3225_v34 }
 0x35d   :  { %2852 = vmatpush1.bf16.msra.mxu0 %v3609_v61 }
 0x35e   :  { %2854 = vmatprep.subr.bf16.mxu0 %v3614_v17  ;;  %2884 = vmatpush3.bf16.msra.mxu1 %v3631_v57 }
 0x35f   :  { %2917 = vmatprep.subr.bf16.mxu1 %v3225_v34 }
 0x361   :  { %2856 = vmatpush1.bf16.msra.mxu0 %v3617_v38 }
 0x362   :  { %2858 = vmatprep.subr.bf16.mxu0 %v3623_v43 }
 0x365   :  { %2860 = vmatpush1.bf16.msra.mxu0 %v3627_v54 }
 0x366   :  { %2886 = vmatprep.subr.bf16.mxu0 %v3569_v41 }
 0x414   :  { %v1129_v62 = vpop.f32.mrb[6].mxu0  ;;  %v1200_v1 = vpop.f32.mrb[14].mxu1 }
 0x415   :  { %v3059_v4 = vadd.f32 %v1129_v62, %v3467_v60  ;;  %v1131_v5 = vpop.f32.mrb[7].mxu0  ;;  %v2464_v11 = vpop.f32.mrb[15].mxu1  ;;  %v1218_v9 = vadd.f32 %v3476_v22, %v1200_v1 }
 0x416   :  { %v3060_v13 = vadd.f32 %v1131_v5, %v3469_v63 }
 0x417   :  { %v2156_v8 = vmul.f32 -1.442695, %v3059_v4 }
 0x418   :  { %v2157_v16 = vmul.f32 -1.442695, %v3060_v13 }
 0x419   :  { %3123 = vpow2.f32 %v2156_v8 }
 0x41a   :  { %3125 = vpow2.f32 %v2157_v16 }
 0x423   :  { %v3124_v24 = vpop.eup %3123 }
 0x424   :  { %v1208_v26 = vadd.f32 1.0, %v3124_v24  ;;  %v3126_v30 = vpop.eup %3125 }
 0x425   :  { %v1215_v31 = vadd.f32 1.0, %v3126_v30 }
 0x426   :  { %3127 = vrcp.f32 %v1208_v26 }
 0x427   :  { %3129 = vrcp.f32 %v1215_v31 }
 0x430   :  { %v3128_v18 = vpop.eup %3127 }
 0x431   :  { %v1219_v25 = vmul.f32 %v3128_v18, %v1218_v9  ;;  %v3130_v37 = vpop.eup %3129 }
 0x432   :  { %v1222_v49 = vsub.f32 1.0, %v3130_v37  ;;  %v1224_v6 = vmul.f32 %v3130_v37, %v3556_v32  ;;  %v1458_v32 = vld [vmem:[#allocation4 + $0x28] sm:$0xff] }
 0x433   :  { %v1220_v27 = vadd.f32 %v1219_v25, %v3455_v42  ;;  %v1455_v42 = vld [vmem:[#allocation4 + $0x10] sm:$0xff] }
 0x434   :  { %v3666_v14 = vpack.c.bf16 %v1458_v32, %v1455_v42 }
 0x435   :  { %3131 = vtanh.f32 %v1220_v27 }
 0x43f   :  { %v3132_v50 = vpop.eup %3131 }
 0x440   :  { %v1223_v59 = vmul.f32 %v3132_v50, %v1222_v49 }
 0x442   :  { %v3643_v10 = vadd.f32 %v1224_v6, %v1223_v59 }
 0x444   :  { %1347 = vmatmul.mubr.f32.vlgmr.msra.gmra.mrb[8].mxu0 %v3643_v10  ;;  %2498 = vmatmul.mubr.f32.vlgmr.msra.gmra.mrb[16].mxu1 %v3643_v10 }
 0x445   :  { %2888 = vmatpush1.bf16.msra.mxu0 %v3571_v46  ;;  %1565 = vmatprep.mubr.f32.mxu0 %v3224_v0 }
 0x446   :  { %2890 = vmatprep.subr.bf16.mxu0 %v3575_v52  ;;  %2532 = vmatprep.mubr.msk.f32.mxu1 %vm3226_vm2, %v3224_v0 }
 0x447   :  { %2919 = vmatpush3.bf16.msra.mxu1 %v3666_v14 }
 0x448   :  { %2920 = vmatprep.subr.bf16.mxu1 %v3225_v34 }
 0x449   :  { %2892 = vmatpush1.bf16.msra.mxu0 %v3577_v40 }
 0x44a   :  { %2894 = vmatprep.subr.bf16.mxu0 %v3581_v58 }
 0x44b   :  { %2922 = vmatpush3.bf16.msra.mxu1 %v3670_v28 }
 0x44c   :  { %2923 = vmatprep.subr.bf16.mxu1 %v3225_v34 }
 0x44d   :  { %2896 = vmatpush1.bf16.msra.mxu0 %v3583_v2 }
 0x44e   :  { %2898 = vmatprep.subr.bf16.mxu0 %v3587_v7 }
 0x44f   :  { %2925 = vmatpush3.bf16.msra.mxu1 %v3674_v48 }
 0x450   :  { %2926 = vmatprep.subr.bf16.mxu1 %v3225_v34 }
 0x451   :  { %2900 = vmatpush1.bf16.msra.mxu0 %v3589_v15 }
 0x452   :  { %2902 = vmatprep.subr.bf16.mxu0 %v3596_v29 }
 0x453   :  { %2928 = vmatpush3.bf16.msra.mxu1 %v3592_v21 }
 0x454   :  { %2929 = vmatprep.subr.bf16.mxu1 %v3225_v34 }
 0x455   :  { %2904 = vmatpush1.bf16.msra.mxu0 %v3599_v12 }
 0x456   :  { %2906 = vmatprep.subr.bf16.mxu0 %v3606_v39 }
 0x457   :  { %2931 = vmatpush3.bf16.msra.mxu1 %v3602_v19 }
 0x458   :  { %2932 = vmatprep.subr.bf16.mxu1 %v3225_v34 }
 0x459   :  { %2908 = vmatpush1.bf16.msra.mxu0 %v3609_v61 }
 0x45a   :  { %2910 = vmatprep.subr.bf16.mxu0 %v3614_v17 }
 0x45b   :  { %2934 = vmatpush3.bf16.msra.mxu1 %v3611_v3 }
 0x45c   :  { %2935 = vmatprep.subr.bf16.mxu1 %v3225_v34 }
 0x45d   :  { %2912 = vmatpush1.bf16.msra.mxu0 %v3617_v38 }
 0x45e   :  { %2914 = vmatprep.subr.bf16.mxu0 %v3623_v43 }
 0x45f   :  { %2937 = vmatpush3.bf16.msra.mxu1 %v3621_v35 }
 0x460   :  { %2938 = vmatprep.subr.bf16.mxu1 %v3225_v34 }
 0x461   :  { %2916 = vmatpush1.bf16.msra.mxu0 %v3627_v54 }
 0x462   :  { %2942 = vmatprep.subr.bf16.mxu0 %v3569_v41 }
 0x463   :  { %2940 = vmatpush3.bf16.msra.mxu1 %v3631_v57 }
 0x464   :  { %2973 = vmatprep.subr.bf16.mxu1 %v3225_v34 }
 0x517   :  { %v1348_v45 = vpop.f32.mrb[8].mxu0  ;;  %v1419_v33 = vpop.f32.mrb[16].mxu1 }
 0x518   :  { %v3061_v55 = vadd.f32 %v1348_v45, %v3467_v60  ;;  %v1350_v62 = vpop.f32.mrb[9].mxu0  ;;  %v2499_v1 = vpop.f32.mrb[17].mxu1  ;;  %v1437_v26 = vadd.f32 %v3476_v22, %v1419_v33 }
 0x519   :  { %v3062_v5 = vadd.f32 %v1350_v62, %v3469_v63 }
 0x51a   :  { %v2158_v4 = vmul.f32 -1.442695, %v3061_v55 }
 0x51b   :  { %v2159_v11 = vmul.f32 -1.442695, %v3062_v5 }
 0x51c   :  { %3133 = vpow2.f32 %v2158_v4 }
 0x51d   :  { %3135 = vpow2.f32 %v2159_v11 }
 0x526   :  { %v3134_v8 = vpop.eup %3133 }
 0x527   :  { %v1427_v13 = vadd.f32 1.0, %v3134_v8  ;;  %v3136_v16 = vpop.eup %3135 }
 0x528   :  { %v1434_v24 = vadd.f32 1.0, %v3136_v16 }
 0x529   :  { %3137 = vrcp.f32 %v1427_v13 }
 0x52a   :  { %3139 = vrcp.f32 %v1434_v24 }
 0x533   :  { %v3138_v30 = vpop.eup %3137 }
 0x534   :  { %v1438_v31 = vmul.f32 %v3138_v30, %v1437_v26  ;;  %v3140_v18 = vpop.eup %3139 }
 0x535   :  { %v1441_v25 = vsub.f32 1.0, %v3140_v18  ;;  %v1443_v49 = vmul.f32 %v3140_v18, %v3643_v10 }
 0x536   :  { %v1439_v9 = vadd.f32 %v1438_v31, %v3461_v51 }
 0x538   :  { %3141 = vtanh.f32 %v1439_v9 }
 0x542   :  { %v3142_v27 = vpop.eup %3141 }
 0x543   :  { %v1442_v37 = vmul.f32 %v3142_v27, %v1441_v25 }
 0x545   :  { %v1444_v50 = vadd.f32 %v1443_v49, %v1442_v37 }
 0x547   :  { %1566 = vmatmul.mubr.f32.vlgmr.msra.gmra.mrb[10].mxu0 %v1444_v50  ;;  %2533 = vmatmul.mubr.f32.vlgmr.msra.gmra.mrb[18].mxu1 %v1444_v50 }
 0x548   :  { %2944 = vmatpush1.bf16.msra.mxu0 %v3571_v46  ;;  %2975 = vmatpush3.bf16.msra.mxu1 %v3666_v14 }
 0x549   :  { %2946 = vmatprep.subr.bf16.mxu0 %v3575_v52  ;;  %2976 = vmatprep.subr.bf16.mxu1 %v3225_v34 }
 0x54a   :  { %1784 = vmatprep.mubr.f32.mxu0 %v3224_v0  ;;  %2567 = vmatprep.mubr.msk.f32.mxu1 %vm3226_vm2, %v3224_v0 }
 0x54c   :  { %2948 = vmatpush1.bf16.msra.mxu0 %v3577_v40  ;;  %2978 = vmatpush3.bf16.msra.mxu1 %v3670_v28 }
 0x54d   :  { %2950 = vmatprep.subr.bf16.mxu0 %v3581_v58  ;;  %2979 = vmatprep.subr.bf16.mxu1 %v3225_v34 }
 0x550   :  { %2952 = vmatpush1.bf16.msra.mxu0 %v3583_v2  ;;  %2981 = vmatpush3.bf16.msra.mxu1 %v3674_v48 }
 0x551   :  { %2954 = vmatprep.subr.bf16.mxu0 %v3587_v7  ;;  %2982 = vmatprep.subr.bf16.mxu1 %v3225_v34 }
 0x554   :  { %2956 = vmatpush1.bf16.msra.mxu0 %v3589_v15  ;;  %2984 = vmatpush3.bf16.msra.mxu1 %v3592_v21 }
 0x555   :  { %2958 = vmatprep.subr.bf16.mxu0 %v3596_v29  ;;  %2985 = vmatprep.subr.bf16.mxu1 %v3225_v34 }
 0x558   :  { %2960 = vmatpush1.bf16.msra.mxu0 %v3599_v12  ;;  %2987 = vmatpush3.bf16.msra.mxu1 %v3602_v19 }
 0x559   :  { %2962 = vmatprep.subr.bf16.mxu0 %v3606_v39  ;;  %2988 = vmatprep.subr.bf16.mxu1 %v3225_v34 }
 0x55c   :  { %2964 = vmatpush1.bf16.msra.mxu0 %v3609_v61  ;;  %2990 = vmatpush3.bf16.msra.mxu1 %v3611_v3 }
 0x55d   :  { %2966 = vmatprep.subr.bf16.mxu0 %v3614_v17  ;;  %2991 = vmatprep.subr.bf16.mxu1 %v3225_v34 }
 0x560   :  { %2968 = vmatpush1.bf16.msra.mxu0 %v3617_v38  ;;  %2993 = vmatpush3.bf16.msra.mxu1 %v3621_v35 }
 0x561   :  { %2970 = vmatprep.subr.bf16.mxu0 %v3623_v43  ;;  %2994 = vmatprep.subr.bf16.mxu1 %v3225_v34 }
 0x564   :  { %2972 = vmatpush1.bf16.msra.mxu0 %v3627_v54  ;;  %2996 = vmatpush3.bf16.msra.mxu1 %v3631_v57 }
 0x565   :  { %2998 = vmatprep.subr.bf16.mxu0 %v3569_v41  ;;  %3029 = vmatprep.subr.bf16.mxu1 %v3225_v34 }
 0x61a   :  { %v1567_v51 = vpop.f32.mrb[10].mxu0  ;;  %v1638_v59 = vpop.f32.mrb[18].mxu1 }
 0x61b   :  { %v3063_v6 = vadd.f32 %v1567_v51, %v3467_v60  ;;  %v1569_v10 = vpop.f32.mrb[11].mxu0  ;;  %v2534_v42 = vpop.f32.mrb[19].mxu1  ;;  %v1656_v41 = vadd.f32 %v3476_v22, %v1638_v59 }
 0x61c   :  { %v3064_v20 = vadd.f32 %v1569_v10, %v3469_v63 }
 0x61d   :  { %v2160_v32 = vmul.f32 -1.442695, %v3063_v6 }
 0x61e   :  { %v2161_v23 = vmul.f32 -1.442695, %v3064_v20 }
 0x61f   :  { %3143 = vpow2.f32 %v2160_v32 }
 0x620   :  { %3145 = vpow2.f32 %v2161_v23 }
 0x629   :  { %v3144_v44 = vpop.eup %3143 }
 0x62a   :  { %v1646_v36 = vadd.f32 1.0, %v3144_v44  ;;  %v3146_v45 = vpop.eup %3145 }
 0x62b   :  { %v1653_v33 = vadd.f32 1.0, %v3146_v45 }
 0x62c   :  { %3147 = vrcp.f32 %v1646_v36 }
 0x62d   :  { %3149 = vrcp.f32 %v1653_v33 }
 0x636   :  { %v3148_v55 = vpop.eup %3147 }
 0x637   :  { %v1657_v62 = vmul.f32 %v3148_v55, %v1656_v41  ;;  %v3150_v4 = vpop.eup %3149 }
 0x638   :  { %v1660_v5 = vsub.f32 1.0, %v3150_v4  ;;  %v1662_v13 = vmul.f32 %v3150_v4, %v1444_v50 }
 0x639   :  { %v1658_v1 = vadd.f32 %v1657_v62, %v3459_v47 }
 0x63b   :  { %3151 = vtanh.f32 %v1658_v1 }
 0x645   :  { %v3152_v11 = vpop.eup %3151 }
 0x646   :  { %v1661_v8 = vmul.f32 %v3152_v11, %v1660_v5 }
 0x648   :  { %v1663_v16 = vadd.f32 %v1662_v13, %v1661_v8 }
 0x64a   :  { %1785 = vmatmul.mubr.f32.vlgmr.msra.gmra.mrb[12].mxu0 %v1663_v16  ;;  %2568 = vmatmul.mubr.f32.vlgmr.msra.gmra.mrb[20].mxu1 %v1663_v16 }
 0x64b   :  { %3000 = vmatpush1.bf16.msra.mxu0 %v3571_v46  ;;  %3031 = vmatpush3.bf16.msra.mxu1 %v3666_v14 }
 0x64c   :  { %3002 = vmatprep.subr.bf16.mxu0 %v3575_v52  ;;  %3032 = vmatprep.subr.bf16.mxu1 %v3225_v34 }
 0x64d   :  { %2003 = vmatprep.mubr.f32.mxu0 %v3224_v0  ;;  %2602 = vmatprep.mubr.msk.f32.mxu1 %vm3226_vm2, %v3224_v0 }
 0x64f   :  { %3004 = vmatpush1.bf16.msra.mxu0 %v3577_v40  ;;  %3034 = vmatpush3.bf16.msra.mxu1 %v3670_v28 }
 0x650   :  { %3006 = vmatprep.subr.bf16.mxu0 %v3581_v58  ;;  %3035 = vmatprep.subr.bf16.mxu1 %v3225_v34 }
 0x653   :  { %3008 = vmatpush1.bf16.msra.mxu0 %v3583_v2  ;;  %3037 = vmatpush3.bf16.msra.mxu1 %v3674_v48 }
 0x654   :  { %3010 = vmatprep.subr.bf16.mxu0 %v3587_v7  ;;  %3038 = vmatprep.subr.bf16.mxu1 %v3225_v34 }
 0x657   :  { %3012 = vmatpush1.bf16.msra.mxu0 %v3589_v15  ;;  %3040 = vmatpush3.bf16.msra.mxu1 %v3592_v21 }
 0x658   :  { %3014 = vmatprep.subr.bf16.mxu0 %v3596_v29  ;;  %3041 = vmatprep.subr.bf16.mxu1 %v3225_v34 }
 0x65b   :  { %3016 = vmatpush1.bf16.msra.mxu0 %v3599_v12  ;;  %3043 = vmatpush3.bf16.msra.mxu1 %v3602_v19 }
 0x65c   :  { %3018 = vmatprep.subr.bf16.mxu0 %v3606_v39  ;;  %3044 = vmatprep.subr.bf16.mxu1 %v3225_v34 }
 0x65f   :  { %3020 = vmatpush1.bf16.msra.mxu0 %v3609_v61  ;;  %3046 = vmatpush3.bf16.msra.mxu1 %v3611_v3 }
 0x660   :  { %3022 = vmatprep.subr.bf16.mxu0 %v3614_v17  ;;  %3047 = vmatprep.subr.bf16.mxu1 %v3225_v34 }
 0x663   :  { %3024 = vmatpush1.bf16.msra.mxu0 %v3617_v38  ;;  %3049 = vmatpush3.bf16.msra.mxu1 %v3621_v35 }
 0x664   :  { %3026 = vmatprep.subr.bf16.mxu0 %v3623_v43  ;;  %3050 = vmatprep.subr.bf16.mxu1 %v3225_v34 }
 0x667   :  { %3028 = vmatpush1.bf16.msra.mxu0 %v3627_v54  ;;  %3052 = vmatpush3.bf16.msra.mxu1 %v3631_v57 }
 0x71d   :  { %v1786_v0 = vpop.f32.mrb[12].mxu0  ;;  %v1857_v47 = vpop.f32.mrb[20].mxu1 }
 0x71e   :  { %v3065_v46 = vadd.f32 %v1786_v0, %v3467_v60  ;;  %v1788_v52 = vpop.f32.mrb[13].mxu0  ;;  %v2569_v40 = vpop.f32.mrb[21].mxu1  ;;  %v1875_v12 = vadd.f32 %v3476_v22, %v1857_v47 }
 0x71f   :  { %v3066_v2 = vadd.f32 %v1788_v52, %v3469_v63 }
 0x720   :  { %v2162_v58 = vmul.f32 -1.442695, %v3065_v46 }
 0x721   :  { %v2163_v7 = vmul.f32 -1.442695, %v3066_v2 }
 0x722   :  { %3153 = vpow2.f32 %v2162_v58 }
 0x723   :  { %3155 = vpow2.f32 %v2163_v7 }
 0x72c   :  { %v3154_v15 = vpop.eup %3153 }
 0x72d   :  { %v1865_v21 = vadd.f32 1.0, %v3154_v15  ;;  %v3156_v34 = vpop.eup %3155 }
 0x72e   :  { %v1872_v29 = vadd.f32 1.0, %v3156_v34 }
 0x72f   :  { %3157 = vrcp.f32 %v1865_v21 }
 0x730   :  { %3159 = vrcp.f32 %v1872_v29 }
 0x739   :  { %v3158_v19 = vpop.eup %3157 }
 0x73a   :  { %v1876_v39 = vmul.f32 %v3158_v19, %v1875_v12  ;;  %v3160_v3 = vpop.eup %3159 }
 0x73b   :  { %v1879_v17 = vsub.f32 1.0, %v3160_v3  ;;  %v1881_v43 = vmul.f32 %v3160_v3, %v1663_v16 }
 0x73c   :  { %v1877_v61 = vadd.f32 %v1876_v39, %v3465_v56 }
 0x73e   :  { %3161 = vtanh.f32 %v1877_v61 }
 0x748   :  { %v3162_v38 = vpop.eup %3161 }
 0x749   :  { %v1880_v35 = vmul.f32 %v3162_v38, %v1879_v17 }
 0x74b   :  { %v1882_v54 = vadd.f32 %v1881_v43, %v1880_v35 }
 0x74d   :  { %2004 = vmatmul.mubr.f32.vlgmr.msra.gmra.mrb[14].mxu0 %v1882_v54  ;;  %2603 = vmatmul.mubr.f32.vlgmr.msra.gmra.mrb[22].mxu1 %v1882_v54 }
 0x820   :  { %v2005_v57 = vpop.f32.mrb[14].mxu0  ;;  %v2076_v14 = vpop.f32.mrb[22].mxu1 }
 0x821   :  { %v3067_v28 = vadd.f32 %v2005_v57, %v3467_v60  ;;  %v2007_v48 = vpop.f32.mrb[15].mxu0  ;;  %v2604_v24 = vpop.f32.mrb[23].mxu1  ;;  %v2094_v27 = vadd.f32 %v3476_v22, %v2076_v14 }
 0x822   :  { %v3068_v30 = vadd.f32 %v2007_v48, %v3469_v63 }
 0x823   :  { %v2164_v26 = vmul.f32 -1.442695, %v3067_v28 }
 0x824   :  { %v2165_v56 = vmul.f32 -1.442695, %v3068_v30 }
 0x825   :  { %3163 = vpow2.f32 %v2164_v26 }
 0x826   :  { %3165 = vpow2.f32 %v2165_v56 }
 0x82f   :  { %v3164_v31 = vpop.eup %3163 }
 0x830   :  { %v2084_v9 = vadd.f32 1.0, %v3164_v31  ;;  %v3166_v18 = vpop.eup %3165 }
 0x831   :  { %v2091_v25 = vadd.f32 1.0, %v3166_v18 }
 0x832   :  { %3167 = vrcp.f32 %v2084_v9 }
 0x833   :  { %3169 = vrcp.f32 %v2091_v25 }
 0x83c   :  { %v3168_v37 = vpop.eup %3167 }
 0x83d   :  { %v2095_v49 = vmul.f32 %v3168_v37, %v2094_v27  ;;  %v3170_v50 = vpop.eup %3169 }
 0x83e   :  { %v2098_v51 = vsub.f32 1.0, %v3170_v50  ;;  %v2100_v6 = vmul.f32 %v3170_v50, %v1882_v54 }
 0x83f   :  { %v2096_v60 = vadd.f32 %v2095_v49, %v3463_v53 }
 0x841   :  { %3171 = vtanh.f32 %v2096_v60 }
 0x84b   :  { %v3172_v59 = vpop.eup %3171 }
 0x84c   :  { %v2099_v63 = vmul.f32 %v3172_v59, %v2098_v51 }
 0x84e   :  { %v2101_v10 = vadd.f32 %v2100_v6, %v2099_v63 }
 0x850   :  { %2107 = vst [vmem:[#allocation7] sm:$0xff] %v2101_v10 }
 0x851   :  { %3206 = shalt.err (!%p3203_p12)
}
 0x852   :  { %s3207_s6 = scalar_lea.hbm %s3790_s5, 128 }
 0x853   :  { %p3208_p13 = scmp.ne.s32.totalorder %s3790_s5, %s3207_s6  ;;  %p3211_p0 = scmp.lt.u32.totalorder %s3207_s6, %s3790_s5 }
 0x855   :  { %p3213_p1 = pnand %p3211_p0, %p3208_p13 }
 0x857   :  { %3216 = shalt.err (!%p3213_p1)
}
 0x858   :  { %2117 = dma.vmem_to_hbm [thread:$0]  %s2115_s27, 128, %s3790_s5, [#allocation6]  }
 0x859   :  { %3219 = dma.done.wait [#allocation6], 128  }
 0x85a   :  { %3220 = vsyncadd [#allocation6], 4294967168 }
 0x85b   :  { %2121 = vsyncpa [#allocation5], 1 }
 0x85c   :  { %2122 = vsyncpa [#allocation6], 1 }

</bundles_post_ra>
